<compile_context>
chip_gen: v6e
topology: v6e:2x2x1
jax: 0.10.0
libtpu: 0.0.40
codegen_flags: <defaults>
</compile_context>

<pallas_src>
import functools

import jax
import jax.numpy as jnp
from jax.experimental import pallas as pl
from jax.experimental.pallas import tpu as pltpu


def _round_up(n, m):
    return ((n + m - 1) // m) * m


def _pick_tb(B):
    """Batch tile: keep >=2 grid steps when B allows it (v7x has 2 TCs to
    shard the parallel axis across), while letting the tile grow toward
    256/512 for large batches (v5e/v6e single core: fewer serial steps)."""
    half = _round_up(max(1, -(-B // 2)), 128)
    return int(min(512, max(128, half)))


def ebm_kernel(c4_ref, x_ref, logit_ref, w1_ref, w2_ref, w3_ref, w4_ref,
               b123_ref, out_ref):
    x = x_ref[...]                                     # (tb, D) bf16, values in {0,1}

    # Bernoulli(probs=p).log_prob(x).sum(-1)
    #   = sum(x * (log p - log1p(-p))) + sum(log1p(-p))
    # logits precomputed in the wrapper; constant folded into c4 (SMEM scalar).
    bd = jnp.sum(x.astype(jnp.float32) * logit_ref[...], axis=-1)   # (tb,) f32

    def swish(v):
        # exp + reciprocal go to the EUP slot; VALU stays free for the rest.
        return v * pl.reciprocal(1.0 + jnp.exp(-v), approx=True)

    b = b123_ref[...]                                  # (3, H) f32

    # Three MXU matmuls in bf16 with f32 accumulation; bias/swish math in f32.
    h = swish(jnp.dot(x, w1_ref[...],
                      preferred_element_type=jnp.float32) + b[0:1, :])
    h = swish(jnp.dot(h.astype(jnp.bfloat16), w2_ref[...],
                      preferred_element_type=jnp.float32) + b[1:2, :])
    h = swish(jnp.dot(h.astype(jnp.bfloat16), w3_ref[...],
                      preferred_element_type=jnp.float32) + b[2:3, :])

    # Final Linear(H -> 1): broadcast-mul + lane reduce (an N=1 matmul would
    # waste the MXU columns).
    logp = jnp.sum(h * w4_ref[...], axis=-1)           # (tb,) f32

    # Combine first, then a single relayout to the lane-dense (1, tb) row.
    out_ref[...] = (logp + bd + c4_ref[0]).reshape(1, -1)


@functools.partial(jax.jit, static_argnames=("tb", "single_buffer_consts"))
def ebm_forward(x, mean, params, *, tb=None, single_buffer_consts=True):
    """x: [B, D] binary {0,1}; mean: [D] Bernoulli probs or None; params: MLP."""
    B, D = x.shape
    H = params["w1"].shape[1]

    if tb is None:
        tb = _pick_tb(B)

    # x is exactly {0,1}: bf16 halves HBM traffic on the largest per-step DMA.
    x = x.astype(jnp.bfloat16)

    grid_b = pl.cdiv(B, tb)
    B_pad = grid_b * tb
    if B_pad != B:
        x = jnp.pad(x, ((0, B_pad - B), (0, 0)))       # padded rows dropped later

    # Precompute Bernoulli terms once, outside the kernel.
    if mean is None:
        logit = jnp.zeros((1, D), jnp.float32)
        const = jnp.float32(0.0)
    else:
        eps = 1e-6                                      # keep finite for p in {0,1}
        p = jnp.clip(mean.astype(jnp.float32), eps, 1.0 - eps)
        logit = (jnp.log(p) - jnp.log1p(-p)).reshape(1, D)
        const = jnp.sum(jnp.log1p(-p))

    w1 = params["w1"].astype(jnp.bfloat16)              # (D, H)
    w2 = params["w2"].astype(jnp.bfloat16)              # (H, H)
    w3 = params["w3"].astype(jnp.bfloat16)              # (H, H)
    w4 = params["w4"].reshape(1, H).astype(jnp.float32)
    b123 = jnp.concatenate(
        [params["b1"], params["b2"], params["b3"]], axis=0).astype(jnp.float32)
    c4 = (params["b4"].reshape(()) + const).reshape(1).astype(jnp.float32)

    # VMEM budget from actual residency:
    #   constant-index operands: 1 buffer each (Buffered(1)), else 2.
    #   x / out tiles: double-buffered by the pipeline.
    wmult = 1 if single_buffer_consts else 2
    fixed_bytes = wmult * (D * 4                 # logit (f32)
                           + D * H * 2           # w1 (bf16)
                           + 2 * H * H * 2       # w2, w3 (bf16)
                           + H * 4               # w4 (f32)
                           + 3 * H * 4)          # b123 (f32)
    tile_bytes = 2 * (tb * D * 2) + 2 * (tb * 4)
    vmem_needed = fixed_bytes + tile_bytes
    try:
        vmem_cap = int(pltpu.get_tpu_info().vmem_capacity_bytes)
    except Exception:
        vmem_cap = 64 << 20                              # conservative (v7x per-TC)
    vmem_limit = int(vmem_needed * 1.25) + (4 << 20)
    vmem_limit = max(vmem_limit, 32 << 20)
    vmem_limit = min(vmem_limit, int(vmem_cap * 0.9))

    pm = pl.Buffered(1) if single_buffer_consts else None

    def const_spec(shape):
        return pl.BlockSpec(shape, lambda i, c4_s: (0, 0), pipeline_mode=pm)

    out = pl.pallas_call(
        ebm_kernel,
        out_shape=jax.ShapeDtypeStruct((1, B_pad), jnp.float32),
        grid_spec=pltpu.PrefetchScalarGridSpec(
            num_scalar_prefetch=1,                       # c4 -> SMEM scalar
            grid=(grid_b,),
            in_specs=[
                pl.BlockSpec((tb, D), lambda i, c4_s: (i, 0)),  # x tile (bf16)
                const_spec((1, D)),                      # Bernoulli logits
                const_spec((D, H)),                      # w1 (bf16)
                const_spec((H, H)),                      # w2 (bf16)
                const_spec((H, H)),                      # w3 (bf16)
                const_spec((1, H)),                      # w4 row (f32)
                const_spec((3, H)),                      # packed b1,b2,b3
            ],
            out_specs=pl.BlockSpec((1, tb), lambda i, c4_s: (0, i)),
        ),
        compiler_params=pltpu.CompilerParams(
            dimension_semantics=("parallel",),
            vmem_limit_bytes=vmem_limit),
    )(c4, x, logit, w1, w2, w3, w4, b123)

    return out[0, :B]                                    # .squeeze() -> [B]


def ebm_reference(x, mean, params, matmul_dtype=jnp.float32):
    """Pure-JAX reference. matmul_dtype=bf16 mirrors the kernel's MXU casts."""
    x = x.astype(jnp.float32)
    if mean is None:
        bd = 0.0
    else:
        log_p = jnp.log(mean)
        log_1mp = jnp.log1p(-mean)
        bd = jnp.sum(x * log_p + (1.0 - x) * log_1mp, axis=-1)
    swish = lambda v: v * jax.nn.sigmoid(v)

    def mm(a, w):
        return jnp.dot(a.astype(matmul_dtype), w.astype(matmul_dtype),
                       preferred_element_type=jnp.float32)

    h = swish(mm(x, params["w1"]) + params["b1"])
    h = swish(mm(h, params["w2"]) + params["b2"])
    h = swish(mm(h, params["w3"]) + params["b3"])
    logp = (h @ params["w4"] + params["b4"])[:, 0]       # last layer stays f32
    return logp + bd


def init_params(key, D, H):
    """Deterministic init mimicking torch.nn.Linear default U[-1/sqrt(fan_in), ...]."""
    ks = jax.random.split(key, 8)

    def lin(kw, kb, fan_in, fan_out):
        bound = 1.0 / jnp.sqrt(fan_in)
        w = jax.random.uniform(kw, (fan_in, fan_out), jnp.float32, -bound, bound)
        b = jax.random.uniform(kb, (1, fan_out), jnp.float32, -bound, bound)
        return w, b

    w1, b1 = lin(ks[0], ks[1], D, H)
    w2, b2 = lin(ks[2], ks[3], H, H)
    w3, b3 = lin(ks[4], ks[5], H, H)
    w4, b4 = lin(ks[6], ks[7], H, 1)
    return dict(w1=w1, b1=b1, w2=w2, b2=b2, w3=w3, b3=b3, w4=w4, b4=b4)


if __name__ == "__main__":
    # MXU/vreg-friendly sizes: D, H multiples of 128; B = 2 tiles of 128 so the
    # parallel grid axis can be sharded across both v7x TensorCores.
    B, D, H = 256, 128, 128
    key = jax.random.PRNGKey(0)
    k_x, k_mean, k_params = jax.random.split(key, 3)

    x = (jax.random.uniform(k_x, (B, D)) > 0.5).astype(jnp.float32)   # binary {0,1}
    mean = jax.random.uniform(k_mean, (D,), jnp.float32, 0.05, 0.95)  # Bernoulli probs
    params = init_params(k_params, D, H)

    extra_kw = {}
    try:
        out = jax.block_until_ready(ebm_forward(x, mean, params))
    except Exception:
        # Fallback if this jax build rejects single-buffered constant operands.
        extra_kw = {"single_buffer_consts": False}
        out = jax.block_until_ready(ebm_forward(x, mean, params, **extra_kw))
    assert out.shape == (B,)

    # Tight check vs. a reference mirroring the kernel's bf16 matmul casts.
    ref_bf16 = ebm_reference(x, mean, params, matmul_dtype=jnp.bfloat16)
    assert jnp.allclose(out, ref_bf16, atol=2e-2, rtol=1e-2), (out[:4], ref_bf16[:4])

    # Loose sanity check vs. the full-f32 reference (bf16 weights change numerics).
    ref_f32 = ebm_reference(x, mean, params, matmul_dtype=jnp.float32)
    assert jnp.allclose(out, ref_f32, atol=2e-1, rtol=1e-2), (out[:4], ref_f32[:4])

    # Ragged-batch path (B not a multiple of the tile) exercises the padding.
    B2 = 200
    out2 = jax.block_until_ready(ebm_forward(x[:B2], mean, params, **extra_kw))
    assert out2.shape == (B2,)
    assert jnp.allclose(out2, ref_bf16[:B2], atol=2e-2, rtol=1e-2)

    print("KERNEL_OK")
</pallas_src>

<mosaic_0001>
module attributes {stable_mosaic.version = 11 : i64} {
  func.func @ebm_kernel(%arg0: i32, %arg1: memref<1xf32, #tpu.memory_space<smem>>, %arg2: memref<128x128xbf16, #tpu.memory_space<vmem>>, %arg3: memref<1x128xf32, #tpu.memory_space<vmem>>, %arg4: memref<128x128xbf16, #tpu.memory_space<vmem>>, %arg5: memref<128x128xbf16, #tpu.memory_space<vmem>>, %arg6: memref<128x128xbf16, #tpu.memory_space<vmem>>, %arg7: memref<1x128xf32, #tpu.memory_space<vmem>>, %arg8: memref<3x128xf32, #tpu.memory_space<vmem>>, %arg9: memref<1x128xf32, #tpu.memory_space<vmem>>) attributes {dimension_semantics = [#tpu.dimension_semantics<parallel>], iteration_bounds = array<i64: 2>, scalar_prefetch = 1 : i64, scratch_operands = 0 : i64, tpu.core_type = #tpu.core_type<tc>, window_params = [{transform_indices = @transform_0, window_bounds = array<i64: 128, 128>}, {pipeline_mode = #tpu.pipeline_mode<synchronous>, transform_indices = @transform_1, window_bounds = array<i64: 1, 128>}, {pipeline_mode = #tpu.pipeline_mode<synchronous>, transform_indices = @transform_2, window_bounds = array<i64: 128, 128>}, {pipeline_mode = #tpu.pipeline_mode<synchronous>, transform_indices = @transform_3, window_bounds = array<i64: 128, 128>}, {pipeline_mode = #tpu.pipeline_mode<synchronous>, transform_indices = @transform_4, window_bounds = array<i64: 128, 128>}, {pipeline_mode = #tpu.pipeline_mode<synchronous>, transform_indices = @transform_5, window_bounds = array<i64: 1, 128>}, {pipeline_mode = #tpu.pipeline_mode<synchronous>, transform_indices = @transform_6, window_bounds = array<i64: 3, 128>}, {transform_indices = @transform_7, window_bounds = array<i64: 1, 128>}]} {
    %c0 = arith.constant 0 : index
    %c0_0 = arith.constant 0 : index
    %0 = vector.load %arg2[%c0, %c0_0] : memref<128x128xbf16, #tpu.memory_space<vmem>>, vector<128x128xbf16>
    %1 = arith.extf %0 : vector<128x128xbf16> to vector<128x128xf32>
    %c0_1 = arith.constant 0 : index
    %c0_2 = arith.constant 0 : index
    %2 = vector.load %arg3[%c0_1, %c0_2] : memref<1x128xf32, #tpu.memory_space<vmem>>, vector<1x128xf32>
    %3 = vector.broadcast %2 : vector<1x128xf32> to vector<128x128xf32>
    %4 = arith.mulf %1, %3 : vector<128x128xf32>
    %cst = arith.constant dense<0.000000e+00> : vector<128xf32>
    %5 = vector.multi_reduction <add>, %4, %cst [1] : vector<128x128xf32> to vector<128xf32>
    %c0_3 = arith.constant 0 : index
    %c0_4 = arith.constant 0 : index
    %6 = vector.load %arg8[%c0_3, %c0_4] : memref<3x128xf32, #tpu.memory_space<vmem>>, vector<3x128xf32>
    %c0_5 = arith.constant 0 : index
    %c0_6 = arith.constant 0 : index
    %7 = vector.load %arg4[%c0_5, %c0_6] : memref<128x128xbf16, #tpu.memory_space<vmem>>, vector<128x128xbf16>
    %cst_7 = arith.constant dense<0.000000e+00> : vector<128x128xf32>
    %8 = tpu.matmul %0, %7, %cst_7 {dimension_numbers = #tpu.dot_dimension_numbers<[1], [0], [0], [1], [0, 0, 1, 1], [], []>} : vector<128x128xbf16>, vector<128x128xbf16>, vector<128x128xf32> -> vector<128x128xf32>
    %9 = vector.extract_strided_slice %6 {offsets = [0, 0], sizes = [1, 128], strides = [1, 1]} : vector<3x128xf32> to vector<1x128xf32>
    %10 = vector.broadcast %9 : vector<1x128xf32> to vector<128x128xf32>
    %11 = arith.addf %8, %10 : vector<128x128xf32>
    %cst_8 = arith.constant 0.000000e+00 : f32
    %12 = vector.broadcast %cst_8 : f32 to vector<128x128xf32>
    %13 = arith.subf %12, %11 : vector<128x128xf32>
    %14 = math.exp %13 : vector<128x128xf32>
    %cst_9 = arith.constant 1.000000e+00 : f32
    %15 = vector.broadcast %cst_9 : f32 to vector<128x128xf32>
    %16 = arith.addf %15, %14 : vector<128x128xf32>
    %17 = tpu.reciprocal %16 {approx = true} : vector<128x128xf32> -> vector<128x128xf32>
    %18 = arith.mulf %11, %17 : vector<128x128xf32>
    %19 = arith.truncf %18 : vector<128x128xf32> to vector<128x128xbf16>
    %c0_10 = arith.constant 0 : index
    %c0_11 = arith.constant 0 : index
    %20 = vector.load %arg5[%c0_10, %c0_11] : memref<128x128xbf16, #tpu.memory_space<vmem>>, vector<128x128xbf16>
    %cst_12 = arith.constant dense<0.000000e+00> : vector<128x128xf32>
    %21 = tpu.matmul %19, %20, %cst_12 {dimension_numbers = #tpu.dot_dimension_numbers<[1], [0], [0], [1], [0, 0, 1, 1], [], []>} : vector<128x128xbf16>, vector<128x128xbf16>, vector<128x128xf32> -> vector<128x128xf32>
    %22 = vector.extract_strided_slice %6 {offsets = [1, 0], sizes = [1, 128], strides = [1, 1]} : vector<3x128xf32> to vector<1x128xf32>
    %23 = vector.broadcast %22 : vector<1x128xf32> to vector<128x128xf32>
    %24 = arith.addf %21, %23 : vector<128x128xf32>
    %cst_13 = arith.constant 0.000000e+00 : f32
    %25 = vector.broadcast %cst_13 : f32 to vector<128x128xf32>
    %26 = arith.subf %25, %24 : vector<128x128xf32>
    %27 = math.exp %26 : vector<128x128xf32>
    %cst_14 = arith.constant 1.000000e+00 : f32
    %28 = vector.broadcast %cst_14 : f32 to vector<128x128xf32>
    %29 = arith.addf %28, %27 : vector<128x128xf32>
    %30 = tpu.reciprocal %29 {approx = true} : vector<128x128xf32> -> vector<128x128xf32>
    %31 = arith.mulf %24, %30 : vector<128x128xf32>
    %32 = arith.truncf %31 : vector<128x128xf32> to vector<128x128xbf16>
    %c0_15 = arith.constant 0 : index
    %c0_16 = arith.constant 0 : index
    %33 = vector.load %arg6[%c0_15, %c0_16] : memref<128x128xbf16, #tpu.memory_space<vmem>>, vector<128x128xbf16>
    %cst_17 = arith.constant dense<0.000000e+00> : vector<128x128xf32>
    %34 = tpu.matmul %32, %33, %cst_17 {dimension_numbers = #tpu.dot_dimension_numbers<[1], [0], [0], [1], [0, 0, 1, 1], [], []>} : vector<128x128xbf16>, vector<128x128xbf16>, vector<128x128xf32> -> vector<128x128xf32>
    %35 = vector.extract_strided_slice %6 {offsets = [2, 0], sizes = [1, 128], strides = [1, 1]} : vector<3x128xf32> to vector<1x128xf32>
    %36 = vector.broadcast %35 : vector<1x128xf32> to vector<128x128xf32>
    %37 = arith.addf %34, %36 : vector<128x128xf32>
    %cst_18 = arith.constant 0.000000e+00 : f32
    %38 = vector.broadcast %cst_18 : f32 to vector<128x128xf32>
    %39 = arith.subf %38, %37 : vector<128x128xf32>
    %40 = math.exp %39 : vector<128x128xf32>
    %cst_19 = arith.constant 1.000000e+00 : f32
    %41 = vector.broadcast %cst_19 : f32 to vector<128x128xf32>
    %42 = arith.addf %41, %40 : vector<128x128xf32>
    %43 = tpu.reciprocal %42 {approx = true} : vector<128x128xf32> -> vector<128x128xf32>
    %44 = arith.mulf %37, %43 : vector<128x128xf32>
    %c0_20 = arith.constant 0 : index
    %c0_21 = arith.constant 0 : index
    %45 = vector.load %arg7[%c0_20, %c0_21] : memref<1x128xf32, #tpu.memory_space<vmem>>, vector<1x128xf32>
    %46 = vector.broadcast %45 : vector<1x128xf32> to vector<128x128xf32>
    %47 = arith.mulf %44, %46 : vector<128x128xf32>
    %cst_22 = arith.constant dense<0.000000e+00> : vector<128xf32>
    %48 = vector.multi_reduction <add>, %47, %cst_22 [1] : vector<128x128xf32> to vector<128xf32>
    %49 = arith.addf %48, %5 : vector<128xf32>
    %c0_23 = arith.constant 0 : index
    %50 = memref.load %arg1[%c0_23] : memref<1xf32, #tpu.memory_space<smem>>
    %51 = vector.broadcast %50 : f32 to vector<128xf32>
    %52 = arith.addf %49, %51 : vector<128xf32>
    %53 = vector.shape_cast %52 : vector<128xf32> to vector<1x128xf32>
    %c0_24 = arith.constant 0 : index
    %c0_25 = arith.constant 0 : index
    %54 = vector.load %arg9[%c0_24, %c0_25] : memref<1x128xf32, #tpu.memory_space<vmem>>, vector<1x128xf32>
    tpu.vector_store %arg9[%c0_24, %c0_25], %53 {strides = array<i32>} : memref<1x128xf32, #tpu.memory_space<vmem>>, vector<1x128xf32>,
    return
  }
  func.func @transform_0(%arg0: i32, %arg1: memref<1xf32, #tpu.memory_space<smem>>) -> (i32, i32) {
    %c0_i32 = arith.constant 0 : i32
    %c0_i32_0 = arith.constant 0 : i32
    return %arg0, %c0_i32 : i32, i32
  }
  func.func @transform_1(%arg0: i32, %arg1: memref<1xf32, #tpu.memory_space<smem>>) -> (i32, i32) {
    %c0_i32 = arith.constant 0 : i32
    %c0_i32_0 = arith.constant 0 : i32
    %c0_i32_1 = arith.constant 0 : i32
    return %c0_i32, %c0_i32_0 : i32, i32
  }
  func.func @transform_2(%arg0: i32, %arg1: memref<1xf32, #tpu.memory_space<smem>>) -> (i32, i32) {
    %c0_i32 = arith.constant 0 : i32
    %c0_i32_0 = arith.constant 0 : i32
    %c0_i32_1 = arith.constant 0 : i32
    return %c0_i32, %c0_i32_0 : i32, i32
  }
  func.func @transform_3(%arg0: i32, %arg1: memref<1xf32, #tpu.memory_space<smem>>) -> (i32, i32) {
    %c0_i32 = arith.constant 0 : i32
    %c0_i32_0 = arith.constant 0 : i32
    %c0_i32_1 = arith.constant 0 : i32
    return %c0_i32, %c0_i32_0 : i32, i32
  }
  func.func @transform_4(%arg0: i32, %arg1: memref<1xf32, #tpu.memory_space<smem>>) -> (i32, i32) {
    %c0_i32 = arith.constant 0 : i32
    %c0_i32_0 = arith.constant 0 : i32
    %c0_i32_1 = arith.constant 0 : i32
    return %c0_i32, %c0_i32_0 : i32, i32
  }
  func.func @transform_5(%arg0: i32, %arg1: memref<1xf32, #tpu.memory_space<smem>>) -> (i32, i32) {
    %c0_i32 = arith.constant 0 : i32
    %c0_i32_0 = arith.constant 0 : i32
    %c0_i32_1 = arith.constant 0 : i32
    return %c0_i32, %c0_i32_0 : i32, i32
  }
  func.func @transform_6(%arg0: i32, %arg1: memref<1xf32, #tpu.memory_space<smem>>) -> (i32, i32) {
    %c0_i32 = arith.constant 0 : i32
    %c0_i32_0 = arith.constant 0 : i32
    %c0_i32_1 = arith.constant 0 : i32
    return %c0_i32, %c0_i32_0 : i32, i32
  }
  func.func @transform_7(%arg0: i32, %arg1: memref<1xf32, #tpu.memory_space<smem>>) -> (i32, i32) {
    %c0_i32 = arith.constant 0 : i32
    %c0_i32_0 = arith.constant 0 : i32
    return %c0_i32, %arg0 : i32, i32
  }
}

module attributes {stable_mosaic.version = 11 : i64} {
  func.func @ebm_kernel(%arg0: i32, %arg1: memref<1xf32, #tpu.memory_space<smem>>, %arg2: memref<128x128xbf16, #tpu.memory_space<vmem>>, %arg3: memref<1x128xf32, #tpu.memory_space<vmem>>, %arg4: memref<128x128xbf16, #tpu.memory_space<vmem>>, %arg5: memref<128x128xbf16, #tpu.memory_space<vmem>>, %arg6: memref<128x128xbf16, #tpu.memory_space<vmem>>, %arg7: memref<1x128xf32, #tpu.memory_space<vmem>>, %arg8: memref<3x128xf32, #tpu.memory_space<vmem>>, %arg9: memref<1x128xf32, #tpu.memory_space<vmem>>) attributes {dimension_semantics = [#tpu.dimension_semantics<parallel>], iteration_bounds = array<i64: 2>, scalar_prefetch = 1 : i64, scratch_operands = 0 : i64, tpu.core_type = #tpu.core_type<tc>, window_params = [{transform_indices = @transform_0, window_bounds = array<i64: 128, 128>}, {pipeline_mode = #tpu.pipeline_mode<synchronous>, transform_indices = @transform_1, window_bounds = array<i64: 1, 128>}, {pipeline_mode = #tpu.pipeline_mode<synchronous>, transform_indices = @transform_2, window_bounds = array<i64: 128, 128>}, {pipeline_mode = #tpu.pipeline_mode<synchronous>, transform_indices = @transform_3, window_bounds = array<i64: 128, 128>}, {pipeline_mode = #tpu.pipeline_mode<synchronous>, transform_indices = @transform_4, window_bounds = array<i64: 128, 128>}, {pipeline_mode = #tpu.pipeline_mode<synchronous>, transform_indices = @transform_5, window_bounds = array<i64: 1, 128>}, {pipeline_mode = #tpu.pipeline_mode<synchronous>, transform_indices = @transform_6, window_bounds = array<i64: 3, 128>}, {transform_indices = @transform_7, window_bounds = array<i64: 1, 128>}]} {
    %c0 = arith.constant 0 : index
    %c0_0 = arith.constant 0 : index
    %0 = vector.load %arg2[%c0, %c0_0] : memref<128x128xbf16, #tpu.memory_space<vmem>>, vector<128x128xbf16>
    %1 = arith.extf %0 : vector<128x128xbf16> to vector<128x128xf32>
    %c0_1 = arith.constant 0 : index
    %c0_2 = arith.constant 0 : index
    %2 = vector.load %arg3[%c0_1, %c0_2] : memref<1x128xf32, #tpu.memory_space<vmem>>, vector<1x128xf32>
    %3 = vector.broadcast %2 : vector<1x128xf32> to vector<128x128xf32>
    %4 = arith.mulf %1, %3 : vector<128x128xf32>
    %cst = arith.constant dense<0.000000e+00> : vector<128xf32>
    %5 = vector.multi_reduction <add>, %4, %cst [1] : vector<128x128xf32> to vector<128xf32>
    %c0_3 = arith.constant 0 : index
    %c0_4 = arith.constant 0 : index
    %6 = vector.load %arg8[%c0_3, %c0_4] : memref<3x128xf32, #tpu.memory_space<vmem>>, vector<3x128xf32>
    %c0_5 = arith.constant 0 : index
    %c0_6 = arith.constant 0 : index
    %7 = vector.load %arg4[%c0_5, %c0_6] : memref<128x128xbf16, #tpu.memory_space<vmem>>, vector<128x128xbf16>
    %cst_7 = arith.constant dense<0.000000e+00> : vector<128x128xf32>
    %8 = tpu.matmul %0, %7, %cst_7 {dimension_numbers = #tpu.dot_dimension_numbers<[1], [0], [0], [1], [0, 0, 1, 1], [], []>} : vector<128x128xbf16>, vector<128x128xbf16>, vector<128x128xf32> -> vector<128x128xf32>
    %9 = vector.extract_strided_slice %6 {offsets = [0, 0], sizes = [1, 128], strides = [1, 1]} : vector<3x128xf32> to vector<1x128xf32>
    %10 = vector.broadcast %9 : vector<1x128xf32> to vector<128x128xf32>
    %11 = arith.addf %8, %10 : vector<128x128xf32>
    %cst_8 = arith.constant 0.000000e+00 : f32
    %12 = vector.broadcast %cst_8 : f32 to vector<128x128xf32>
    %13 = arith.subf %12, %11 : vector<128x128xf32>
    %14 = math.exp %13 : vector<128x128xf32>
    %cst_9 = arith.constant 1.000000e+00 : f32
    %15 = vector.broadcast %cst_9 : f32 to vector<128x128xf32>
    %16 = arith.addf %15, %14 : vector<128x128xf32>
    %17 = tpu.reciprocal %16 {approx = true} : vector<128x128xf32> -> vector<128x128xf32>
    %18 = arith.mulf %11, %17 : vector<128x128xf32>
    %19 = arith.truncf %18 : vector<128x128xf32> to vector<128x128xbf16>
    %c0_10 = arith.constant 0 : index
    %c0_11 = arith.constant 0 : index
    %20 = vector.load %arg5[%c0_10, %c0_11] : memref<128x128xbf16, #tpu.memory_space<vmem>>, vector<128x128xbf16>
    %cst_12 = arith.constant dense<0.000000e+00> : vector<128x128xf32>
    %21 = tpu.matmul %19, %20, %cst_12 {dimension_numbers = #tpu.dot_dimension_numbers<[1], [0], [0], [1], [0, 0, 1, 1], [], []>} : vector<128x128xbf16>, vector<128x128xbf16>, vector<128x128xf32> -> vector<128x128xf32>
    %22 = vector.extract_strided_slice %6 {offsets = [1, 0], sizes = [1, 128], strides = [1, 1]} : vector<3x128xf32> to vector<1x128xf32>
    %23 = vector.broadcast %22 : vector<1x128xf32> to vector<128x128xf32>
    %24 = arith.addf %21, %23 : vector<128x128xf32>
    %cst_13 = arith.constant 0.000000e+00 : f32
    %25 = vector.broadcast %cst_13 : f32 to vector<128x128xf32>
    %26 = arith.subf %25, %24 : vector<128x128xf32>
    %27 = math.exp %26 : vector<128x128xf32>
    %cst_14 = arith.constant 1.000000e+00 : f32
    %28 = vector.broadcast %cst_14 : f32 to vector<128x128xf32>
    %29 = arith.addf %28, %27 : vector<128x128xf32>
    %30 = tpu.reciprocal %29 {approx = true} : vector<128x128xf32> -> vector<128x128xf32>
    %31 = arith.mulf %24, %30 : vector<128x128xf32>
    %32 = arith.truncf %31 : vector<128x128xf32> to vector<128x128xbf16>
    %c0_15 = arith.constant 0 : index
    %c0_16 = arith.constant 0 : index
    %33 = vector.load %arg6[%c0_15, %c0_16] : memref<128x128xbf16, #tpu.memory_space<vmem>>, vector<128x128xbf16>
    %cst_17 = arith.constant dense<0.000000e+00> : vector<128x128xf32>
    %34 = tpu.matmul %32, %33, %cst_17 {dimension_numbers = #tpu.dot_dimension_numbers<[1], [0], [0], [1], [0, 0, 1, 1], [], []>} : vector<128x128xbf16>, vector<128x128xbf16>, vector<128x128xf32> -> vector<128x128xf32>
    %35 = vector.extract_strided_slice %6 {offsets = [2, 0], sizes = [1, 128], strides = [1, 1]} : vector<3x128xf32> to vector<1x128xf32>
    %36 = vector.broadcast %35 : vector<1x128xf32> to vector<128x128xf32>
    %37 = arith.addf %34, %36 : vector<128x128xf32>
    %cst_18 = arith.constant 0.000000e+00 : f32
    %38 = vector.broadcast %cst_18 : f32 to vector<128x128xf32>
    %39 = arith.subf %38, %37 : vector<128x128xf32>
    %40 = math.exp %39 : vector<128x128xf32>
    %cst_19 = arith.constant 1.000000e+00 : f32
    %41 = vector.broadcast %cst_19 : f32 to vector<128x128xf32>
    %42 = arith.addf %41, %40 : vector<128x128xf32>
    %43 = tpu.reciprocal %42 {approx = true} : vector<128x128xf32> -> vector<128x128xf32>
    %44 = arith.mulf %37, %43 : vector<128x128xf32>
    %c0_20 = arith.constant 0 : index
    %c0_21 = arith.constant 0 : index
    %45 = vector.load %arg7[%c0_20, %c0_21] : memref<1x128xf32, #tpu.memory_space<vmem>>, vector<1x128xf32>
    %46 = vector.broadcast %45 : vector<1x128xf32> to vector<128x128xf32>
    %47 = arith.mulf %44, %46 : vector<128x128xf32>
    %cst_22 = arith.constant dense<0.000000e+00> : vector<128xf32>
    %48 = vector.multi_reduction <add>, %47, %cst_22 [1] : vector<128x128xf32> to vector<128xf32>
    %49 = arith.addf %48, %5 : vector<128xf32>
    %c0_23 = arith.constant 0 : index
    %50 = memref.load %arg1[%c0_23] : memref<1xf32, #tpu.memory_space<smem>>
    %51 = vector.broadcast %50 : f32 to vector<128xf32>
    %52 = arith.addf %49, %51 : vector<128xf32>
    %53 = vector.shape_cast %52 : vector<128xf32> to vector<1x128xf32>
    %c0_24 = arith.constant 0 : index
    %c0_25 = arith.constant 0 : index
    %54 = vector.load %arg9[%c0_24, %c0_25] : memref<1x128xf32, #tpu.memory_space<vmem>>, vector<1x128xf32>
    tpu.vector_store %arg9[%c0_24, %c0_25], %53 {strides = array<i32>} : memref<1x128xf32, #tpu.memory_space<vmem>>, vector<1x128xf32>,
    return
  }
  func.func @transform_0(%arg0: i32, %arg1: memref<1xf32, #tpu.memory_space<smem>>) -> (i32, i32) {
    %c0_i32 = arith.constant 0 : i32
    %c0_i32_0 = arith.constant 0 : i32
    return %arg0, %c0_i32 : i32, i32
  }
  func.func @transform_1(%arg0: i32, %arg1: memref<1xf32, #tpu.memory_space<smem>>) -> (i32, i32) {
    %c0_i32 = arith.constant 0 : i32
    %c0_i32_0 = arith.constant 0 : i32
    %c0_i32_1 = arith.constant 0 : i32
    return %c0_i32, %c0_i32_0 : i32, i32
  }
  func.func @transform_2(%arg0: i32, %arg1: memref<1xf32, #tpu.memory_space<smem>>) -> (i32, i32) {
    %c0_i32 = arith.constant 0 : i32
    %c0_i32_0 = arith.constant 0 : i32
    %c0_i32_1 = arith.constant 0 : i32
    return %c0_i32, %c0_i32_0 : i32, i32
  }
  func.func @transform_3(%arg0: i32, %arg1: memref<1xf32, #tpu.memory_space<smem>>) -> (i32, i32) {
    %c0_i32 = arith.constant 0 : i32
    %c0_i32_0 = arith.constant 0 : i32
    %c0_i32_1 = arith.constant 0 : i32
    return %c0_i32, %c0_i32_0 : i32, i32
  }
  func.func @transform_4(%arg0: i32, %arg1: memref<1xf32, #tpu.memory_space<smem>>) -> (i32, i32) {
    %c0_i32 = arith.constant 0 : i32
    %c0_i32_0 = arith.constant 0 : i32
    %c0_i32_1 = arith.constant 0 : i32
    return %c0_i32, %c0_i32_0 : i32, i32
  }
  func.func @transform_5(%arg0: i32, %arg1: memref<1xf32, #tpu.memory_space<smem>>) -> (i32, i32) {
    %c0_i32 = arith.constant 0 : i32
    %c0_i32_0 = arith.constant 0 : i32
    %c0_i32_1 = arith.constant 0 : i32
    return %c0_i32, %c0_i32_0 : i32, i32
  }
  func.func @transform_6(%arg0: i32, %arg1: memref<1xf32, #tpu.memory_space<smem>>) -> (i32, i32) {
    %c0_i32 = arith.constant 0 : i32
    %c0_i32_0 = arith.constant 0 : i32
    %c0_i32_1 = arith.constant 0 : i32
    return %c0_i32, %c0_i32_0 : i32, i32
  }
  func.func @transform_7(%arg0: i32, %arg1: memref<1xf32, #tpu.memory_space<smem>>) -> (i32, i32) {
    %c0_i32 = arith.constant 0 : i32
    %c0_i32_0 = arith.constant 0 : i32
    return %c0_i32, %arg0 : i32, i32
  }
}

</mosaic_0001>

<bundles_post_ra>
// kernel: ebm_forward.1
= control target key start
LH: loop header
LB: loop body
LE: loop exit
PB: predicated region body
PF: predicated region fallthrough
CT: control target
= control target key end

     0   :  { %s2647_s0 = inlined_call_operand.<no memory space> [shape: f32[1], index: 0, kind: input, shape index: {}]   ;;  %s2648_s1 = inlined_call_operand.vmem [shape: bf16[256,128], index: 1, kind: input, shape index: {}]   ;;  %s2649_s2 = inlined_call_operand.vmem [shape: f32[1,128], index: 2, kind: input, shape index: {}]   ;;  %s2650_s3 = inlined_call_operand.vmem [shape: bf16[128,128], index: 3, kind: input, shape index: {}]   ;;  %s2651_s4 = inlined_call_operand.vmem [shape: bf16[128,128], index: 4, kind: input, shape index: {}]   ;;  %s2652_s5 = inlined_call_operand.vmem [shape: bf16[128,128], index: 5, kind: input, shape index: {}]   ;;  %s2653_s6 = inlined_call_operand.vmem [shape: f32[1,128], index: 6, kind: input, shape index: {}]   ;;  %s2654_s7 = inlined_call_operand.vmem [shape: f32[3,128], index: 7, kind: input, shape index: {}]   ;;  %s2655_s8 = inlined_call_operand.hbm [shape: f32[1,256], index: 8, kind: output, shape index: {}]  }
   0x1   :  { %13 = sst [smem:[#allocation3]] %s2647_s0 }
   0x2   :  { %14 = vsyncpa [#allocation5], 0 }
   0x3   :  { %16 = vsyncpa [#allocation5 + $0x1], 0  ;;  %s2087_s29 = smov 0   ;;  %s2089_s30 = smov 0  }
   0x4   :  { %s2091_s9 = smov 0   ;;  %s2093_s10 = smov 0  }
   0x5 LB: > { %s1501_s0 = sadd.s32 4294967295, %s2036_s10   ;;  %s1502_s11 = sadd.s32 4294967294, %s2036_s10   ;;  %s2036_s10 = sphi %s2093_s10, %s2661_s10   ;;  %s2032_s9 = sphi %s2091_s9, %s2660_s9   ;;  %s2028_s30 = sphi %s2089_s30, %s2659_s30   ;;  %s2024_s29 = sphi %s2087_s29, %s2658_s29  }
   0x6   : > { %s2110_s12 = sadd.s32 1, %s2036_s10   ;;  %s181_s13 = sadd.s32 1, %s2032_s9 }
   0x7   : > { %s178_s14 = ssub.s32 %s2036_s10, %s2110_s12  ;;  %p191_p0 = scmp.ne.s32.totalorder %s2032_s9, %s2028_s30 }
   0x8   : > { %p179_p1 = scmp.eq.s32.totalorder %s178_s14, 0  ;;  %p192_p2 = scmp.eq.s32.totalorder %s1501_s0, 1 }
   0x9   : > { %p197_p3 = scmp.ne.s32.totalorder %s2028_s30, %s2024_s29  ;;  %p198_p4 = scmp.eq.s32.totalorder %s1502_s11, 1 }
   0xa   : > { %s2120_s15 = scalar_select %p179_p1, %s2032_s9, %s181_s13  }
   0xb   : > { %p2122_p5 = por %p192_p2, %p191_p0  ;;  %p2126_p6 = por %p198_p4, %p197_p3 }
   0xc   : > { %p1505_p7 = scmp.ge.s32.totalorder %s2036_s10, 1  ;;  %p243_p8 = scmp.lt.s32.totalorder %s2036_s10, 3 }
   0xe   : > { %p244_p9 = pnand %p1505_p7, %p243_p8 }
   0xf   : > { %s2135_s20 = sshll.u32 (!%p244_p9), %s1501_s0, 4  ;;  %s1287_s22 = sld [smem:[#allocation3]] (!%p244_p9) }
  0x10   : > { %247 = sbr.rel (%p244_p9) target bundleno = 985 (0x3d9), region = 48  ;;  %p275_p10 = scmp.lt.s32.totalorder (!%p244_p9), %s2135_s20, 31 }
  0x11   : > { %s2610_s28 = scalar_lea.hbm (!%p244_p9), %s2655_s8, %s2135_s20  ;;  %s2038_s14 = smov (!%p244_p9), [#allocation4]  }
  0x15   : > { %v1744_v0 = vld [vmem:[%s2650_s3 + $0x38] sm:$0xff]   ;;  %v1745_v1 = vld [vmem:[%s2650_s3 + $0x30] sm:$0xff]   ;;  %s276_s23 = scalar_select %p275_p10, %s2135_s20, 31  ;;  %v1746_v2 = vld [vmem:[%s2650_s3 + $0x28] sm:$0xff]   ;;  %v385_v24 = vlaneseq  ;;  %vm1332_vm0 = vcmask 130112   ;;  %vm1339_vm1 = vcmask 195712  }
  0x16   : > { %1593 = vmatprep.subr.bf16.mxu0 %v1744_v0  ;;  %v1747_v3 = vld [vmem:[%s2650_s3 + $0x20] sm:$0xff]   ;;  %v1748_v5 = vld [vmem:[%s2650_s3 + $0x18] sm:$0xff]   ;;  %v1749_v6 = vld [vmem:[%s2650_s3 + $0x10] sm:$0xff]   ;;  %vm1346_vm2 = vcmask 261312   ;;  %vm1353_vm3 = vcmask 326912   ;;  %vm1360_vm4 = vcmask 392512  }
  0x17   : > { %1594 = vmatpush3.bf16.msra.mxu0 %v1744_v0  ;;  %s1507_s26 = sshll.u32 %s276_s23, 2  ;;  %v1750_v7 = vld [vmem:[%s2650_s3 + $0x8] sm:$0xff]   ;;  %v1751_v8 = vld [vmem:[%s2650_s3] sm:$0xff]   ;;  %v1760_v16 = vld [vmem:[%s2651_s4 + $0x38] sm:$0xff]   ;;  %v2222_v25 = vshrl.u32 %v385_v24, 7  ;;  %vm1367_vm5 = vcmask 458112  }
  0x18   : > { %1595 = vmatprep.subr.bf16.mxu0 %v1745_v1  ;;  %s2148_s0 = scalar_lea.vmem %s2648_s1, %s1507_s26  ;;  %1625 = vmatprep.subr.bf16.mxu1 %v1760_v16  ;;  %v1761_v17 = vld [vmem:[%s2651_s4 + $0x30] sm:$0xff]   ;;  %v1762_v18 = vld [vmem:[%s2651_s4 + $0x28] sm:$0xff]   ;;  %v1763_v19 = vld [vmem:[%s2651_s4 + $0x20] sm:$0xff]   ;;  %vm1374_vm6 = vcmask 523712   ;;  %vm1381_vm7 = vcmask 589312   ;;  %vm1388_vm8 = vcmask 654912  }
  0x19   : > { %v2154_v4 = vld [vmem:[%s2148_s0] sm:$0xff]   ;;  %v2170_v9 = vld [vmem:[%s2148_s0 + $0x8] sm:$0xff]   ;;  %v2173_v10 = vld [vmem:[%s2148_s0 + $0x10] sm:$0xff]   ;;  %1626 = vmatpush3.bf16.msra.mxu1 %v1760_v16  ;;  %v387_v26 = vsub.s32 0, %v2222_v25  ;;  %vm1395_vm9 = vcmask 720512   ;;  %s272_s23 = sand.u32 1, %s2028_s30  }
  0x1a   : > { %1609 = vmatprep.mubr.bf16.mxu0 %v2154_v4  ;;  %v2178_v11 = vld [vmem:[%s2148_s0 + $0x18] sm:$0xff]   ;;  %v2181_v12 = vld [vmem:[%s2148_s0 + $0x20] sm:$0xff]   ;;  %v2186_v13 = vld [vmem:[%s2148_s0 + $0x28] sm:$0xff]   ;;  %1627 = vmatprep.subr.bf16.mxu1 %v1761_v17  ;;  %vm1402_vm10 = vcmask 786112   ;;  %vm1409_vm11 = vcmask 851712   ;;  %vm1416_vm12 = vcmask 917312  }
  0x1b   : > { %1596 = vmatpush3.bf16.msra.mxu0 %v1745_v1  ;;  %v2189_v14 = vld [vmem:[%s2148_s0 + $0x30] sm:$0xff]   ;;  %v2194_v15 = vld [vmem:[%s2148_s0 + $0x38] sm:$0xff]   ;;  %v1766_v22 = vld [vmem:[%s2651_s4 + $0x8] sm:$0xff]   ;;  %vm1423_vm13 = vcmask 982912   ;;  %s273_s24 = scalar_lea.vmem [#allocation4], %s272_s23  ;;  %vm1430_vm14 = vcmask 1048512  }
  0x1c   : > { %1597 = vmatprep.subr.bf16.mxu0 %v1746_v2  ;;  %v1764_v20 = vld [vmem:[%s2651_s4 + $0x18] sm:$0xff]   ;;  %v1765_v21 = vld [vmem:[%s2651_s4 + $0x10] sm:$0xff]   ;;  %v1767_v23 = vld [vmem:[%s2651_s4] sm:$0xff]   ;;  %s1447_s25 = sshll.u32 %s273_s24, 4  ;;  %s1435_s11 = scalar_lea.sflag [#allocation5], %s272_s23  ;;  %s1448_s25 = int_to_ptr.vmem [resolvable:$true] %s1447_s25 }
  0x1d   : > { %1628 = vmatpush3.bf16.msra.mxu1 %v1761_v17  ;;  %v2228_v27 = vld [vmem:[%s2654_s7] sm:$0x7]  ;;  %s1976_s13 = scalar_lea.vmem %s1448_s25, 16  ;;  %s1980_s0 = sshll.u32 %s2038_s14, 4  ;;  %s1981_s0 = int_to_ptr.vmem [resolvable:$false] %s1980_s0 }
  0x1e   : > { %1629 = vmatprep.subr.bf16.mxu1 %v1762_v18  ;;  %v2231_v28 = vrot.slane %v2228_v27, %v387_v26  ;;  %p1977_p11 = scmp.ne.s32.totalorder %s1448_s25, %s1976_s13  ;;  %s1982_s18 = scalar_lea.vmem %s1981_s0, 32 }
  0x1f   : > { %1598 = vmatpush3.bf16.msra.mxu0 %v1746_v2  ;;  %p1983_p0 = scmp.lt.s32.totalorder %s1448_s25, %s1981_s0  ;;  %p1984_p1 = scmp.lt.s32.totalorder %s1982_s18, %s1976_s13 }
  0x20   : > { %1599 = vmatprep.subr.bf16.mxu0 %v1747_v3  ;;  %p1978_p12 = pnand %p1977_p11, %p2122_p5 }
  0x21   : > { %1630 = vmatpush3.bf16.msra.mxu1 %v1762_v18  ;;  %p1985_p2 = por %p1984_p1, %p1983_p0 }
  0x22   : > { %1631 = vmatprep.subr.bf16.mxu1 %v1763_v19  ;;  %p1979_p13 = pneg %p1978_p12 }
  0x23   : > { %1600 = vmatpush3.bf16.msra.mxu0 %v1747_v3 }
  0x24   : > { %1601 = vmatprep.subr.bf16.mxu0 %v1748_v5  ;;  %p1986_p3 = pnand %p1985_p2, %p1979_p13 }
  0x25   : > { %1632 = vmatpush3.bf16.msra.mxu1 %v1763_v19 }
  0x26   : > { %1633 = vmatprep.subr.bf16.mxu1 %v1764_v20 }
  0x27   : > { %1602 = vmatpush3.bf16.msra.mxu0 %v1748_v5 }
  0x28   : > { %1603 = vmatprep.subr.bf16.mxu0 %v1749_v6 }
  0x29   : > { %1634 = vmatpush3.bf16.msra.mxu1 %v1764_v20 }
  0x2a   : > { %1635 = vmatprep.subr.bf16.mxu1 %v1765_v21 }
  0x2b   : > { %1604 = vmatpush3.bf16.msra.mxu0 %v1749_v6 }
  0x2c   : > { %1605 = vmatprep.subr.bf16.mxu0 %v1750_v7 }
  0x2d   : > { %1636 = vmatpush3.bf16.msra.mxu1 %v1765_v21 }
  0x2e   : > { %1637 = vmatprep.subr.bf16.mxu1 %v1766_v22 }
  0x2f   : > { %1606 = vmatpush3.bf16.msra.mxu0 %v1750_v7 }
  0x30   : > { %1607 = vmatprep.subr.bf16.mxu0 %v1751_v8 }
  0x31   : > { %1638 = vmatpush3.bf16.msra.mxu1 %v1766_v22 }
  0x32   : > { %1639 = vmatprep.subr.bf16.mxu1 %v1767_v23 }
  0x33   : > { %1608 = vmatpush3.bf16.msra.mxu0 %v1751_v8 }
  0x35   : > { %1640 = vmatpush3.bf16.msra.mxu1 %v1767_v23 }
  0x36   : > { %1610 = vmatmul.mubr.bf16.vlgmr.msra.gmra.mxu0 %v2170_v9 }
  0x37   : > { %1613 = vmatprep.mubr.bf16.mxu0 %v2173_v10 }
  0x3e   : > { %1614 = vmatmul.mubr.bf16.gmra.mxu0 %v2178_v11 }
  0x3f   : > { %1617 = vmatprep.mubr.bf16.mxu0 %v2181_v12 }
  0x46   : > { %1618 = vmatmul.mubr.bf16.gmra.mxu0 %v2186_v13 }
  0x47   : > { %1621 = vmatprep.mubr.bf16.mxu0 %v2189_v14 }
  0x4e   : > { %1622 = vmatmul.mubr.bf16.gmra.mxu0 %v2194_v15 }
  0xf6   : > { %v1611_v29 = vpop.f32.mrf.mxu0 }
  0xf7   : > { %v2234_v30 = vadd.f32 %v1611_v29, %v2231_v28 }
  0xf8   : > { %v519_v31 = vpop.f32.mrf.mxu0 }
  0xf9   : > { %v584_v32 = vsub.f32 0.0, %v2234_v30  ;;  %v2238_v33 = vadd.f32 %v519_v31, %v2231_v28 }
  0xfa   : > { %v1612_v34 = vpop.f32.mrf.mxu0 }
  0xfb   : > { %v602_v35 = vmul.f32 1.442695, %v584_v32  ;;  %v582_v36 = vsub.f32 0.0, %v2238_v33  ;;  %v2242_v37 = vadd.f32 %v1612_v34, %v2231_v28 }
  0xfc   : > { %v522_v38 = vpop.f32.mrf.mxu0 }
  0xfd   : > { %1784 = vpow2.f32 %v602_v35  ;;  %v598_v39 = vmul.f32 1.442695, %v582_v36  ;;  %v585_v40 = vsub.f32 0.0, %v2242_v37  ;;  %v2246_v41 = vadd.f32 %v522_v38, %v2231_v28 }
  0xfe   : > { %v1615_v42 = vpop.f32.mrf.mxu0 }
  0xff   : > { %1786 = vpow2.f32 %v598_v39  ;;  %v604_v43 = vmul.f32 1.442695, %v585_v40  ;;  %v583_v44 = vsub.f32 0.0, %v2246_v41  ;;  %v2250_v45 = vadd.f32 %v1615_v42, %v2231_v28 }
 0x100   : > { %v535_v46 = vpop.f32.mrf.mxu0 }
 0x101   : > { %1788 = vpow2.f32 %v604_v43  ;;  %v600_v47 = vmul.f32 1.442695, %v583_v44  ;;  %v588_v48 = vsub.f32 0.0, %v2250_v45  ;;  %v2254_v49 = vadd.f32 %v535_v46, %v2231_v28 }
 0x102   : > { %v1616_v50 = vpop.f32.mrf.mxu0 }
 0x103   : > { %1790 = vpow2.f32 %v600_v47  ;;  %v610_v51 = vmul.f32 1.442695, %v588_v48  ;;  %v586_v52 = vsub.f32 0.0, %v2254_v49  ;;  %v2258_v53 = vadd.f32 %v1616_v50, %v2231_v28 }
 0x104   : > { %v538_v54 = vpop.f32.mrf.mxu0 }
 0x105   : > { %1792 = vpow2.f32 %v610_v51  ;;  %v606_v55 = vmul.f32 1.442695, %v586_v52  ;;  %v589_v56 = vsub.f32 0.0, %v2258_v53  ;;  %v2262_v57 = vadd.f32 %v538_v54, %v2231_v28 }
 0x106   : > { %v1619_v58 = vpop.f32.mrf.mxu0 }
 0x107   : > { %1794 = vpow2.f32 %v606_v55  ;;  %v612_v59 = vmul.f32 1.442695, %v589_v56  ;;  %v587_v60 = vsub.f32 0.0, %v2262_v57  ;;  %v2266_v61 = vadd.f32 %v1619_v58, %v2231_v28 }
 0x108   : > { %v551_v62 = vpop.f32.mrf.mxu0 }
 0x109   : > { %1796 = vpow2.f32 %v612_v59  ;;  %v608_v63 = vmul.f32 1.442695, %v587_v60  ;;  %v592_v0 = vsub.f32 0.0, %v2266_v61  ;;  %v2270_v1 = vadd.f32 %v551_v62, %v2231_v28 }
 0x10a   : > { %v1785_v2 = vpop.eup %1784  ;;  %v1620_v3 = vpop.f32.mrf.mxu0 }
 0x10b   : > { %v632_v5 = vadd.f32 1.0, %v1785_v2  ;;  %1798 = vpow2.f32 %v608_v63  ;;  %v618_v6 = vmul.f32 1.442695, %v592_v0  ;;  %v590_v7 = vsub.f32 0.0, %v2270_v1 }
 0x10c   : > { %v1787_v8 = vpop.eup %1786  ;;  %v2274_v16 = vadd.f32 %v1620_v3, %v2231_v28  ;;  %v554_v17 = vpop.f32.mrf.mxu0 }
 0x10d   : > { %1800 = vrcp.f32 %v632_v5  ;;  %v630_v18 = vadd.f32 1.0, %v1787_v8  ;;  %v614_v19 = vmul.f32 1.442695, %v590_v7  ;;  %v2277_v20 = vadd.f32 %v554_v17, %v2231_v28 }
 0x10e   : > { %v1789_v21 = vpop.eup %1788  ;;  %1802 = vpow2.f32 %v618_v6  ;;  %v593_v22 = vsub.f32 0.0, %v2274_v16  ;;  %v1623_v23 = vpop.f32.mrf.mxu0 }
 0x10f   : > { %1804 = vrcp.f32 %v630_v18  ;;  %v633_v26 = vadd.f32 1.0, %v1789_v21  ;;  %v591_v29 = vsub.f32 0.0, %v2277_v20  ;;  %v2282_v31 = vadd.f32 %v1623_v23, %v2231_v28 }
 0x110   : > { %v1791_v32 = vpop.eup %1790  ;;  %1806 = vpow2.f32 %v614_v19  ;;  %v620_v34 = vmul.f32 1.442695, %v593_v22  ;;  %v567_v35 = vpop.f32.mrf.mxu0 }
 0x111   : > { %1808 = vrcp.f32 %v633_v26  ;;  %v631_v36 = vadd.f32 1.0, %v1791_v32  ;;  %v616_v38 = vmul.f32 1.442695, %v591_v29  ;;  %v596_v39 = vsub.f32 0.0, %v2282_v31 }
 0x112   : > { %v1793_v40 = vpop.eup %1792  ;;  %1810 = vpow2.f32 %v620_v34  ;;  %v2286_v42 = vadd.f32 %v567_v35, %v2231_v28  ;;  %v1624_v43 = vpop.f32.mrf.mxu0 }
 0x113   : > { %1812 = vrcp.f32 %v631_v36  ;;  %v636_v44 = vadd.f32 1.0, %v1793_v40  ;;  %v626_v46 = vmul.f32 1.442695, %v596_v39  ;;  %v2289_v47 = vadd.f32 %v1624_v43, %v2231_v28 }
 0x114   : > { %v1795_v48 = vpop.eup %1794  ;;  %1814 = vpow2.f32 %v616_v38  ;;  %v594_v50 = vsub.f32 0.0, %v2286_v42  ;;  %v570_v51 = vpop.f32.mrf.mxu0 }
 0x115   : > { %1816 = vrcp.f32 %v636_v44  ;;  %v634_v52 = vadd.f32 1.0, %v1795_v48  ;;  %v597_v54 = vsub.f32 0.0, %v2289_v47  ;;  %v2294_v55 = vadd.f32 %v570_v51, %v2231_v28 }
 0x116   : > { %v1797_v56 = vpop.eup %1796  ;;  %1818 = vpow2.f32 %v626_v46  ;;  %v622_v58 = vmul.f32 1.442695, %v594_v50 }
 0x117   : > { %1820 = vrcp.f32 %v634_v52  ;;  %v637_v59 = vadd.f32 1.0, %v1797_v56  ;;  %v628_v60 = vmul.f32 1.442695, %v597_v54  ;;  %v595_v62 = vsub.f32 0.0, %v2294_v55 }
 0x118   : > { %v1799_v63 = vpop.eup %1798  ;;  %1822 = vpow2.f32 %v622_v58 }
 0x119   : > { %1824 = vrcp.f32 %v637_v59  ;;  %v635_v0 = vadd.f32 1.0, %v1799_v63  ;;  %v624_v2 = vmul.f32 1.442695, %v595_v62 }
 0x11a   : > { %v1801_v3 = vpop.eup %1800  ;;  %1826 = vpow2.f32 %v628_v60 }
 0x11b   : > { %v1803_v5 = vpop.eup %1802  ;;  %1828 = vrcp.f32 %v635_v0  ;;  %v664_v34 = vmul.f32 %v1801_v3, %v2234_v30 }
 0x11c   : > { %v1805_v6 = vpop.eup %1804  ;;  %1830 = vpow2.f32 %v624_v2  ;;  %v640_v18 = vadd.f32 1.0, %v1803_v5 }
 0x11d   : > { %v1807_v28 = vpop.eup %1806  ;;  %v662_v26 = vmul.f32 %v1805_v6, %v2238_v33 }
 0x11e   : > { %v1809_v7 = vpop.eup %1808  ;;  %v638_v8 = vadd.f32 1.0, %v1807_v28 }
 0x11f   : > { %v1811_v17 = vpop.eup %1810  ;;  %v665_v21 = vmul.f32 %v1809_v7, %v2242_v37 }
 0x120   : > { %v1813_v19 = vpop.eup %1812  ;;  %v641_v22 = vadd.f32 1.0, %v1811_v17  ;;  %1832 = vrcp.f32 %v638_v8 }
 0x121   : > { %v1815_v23 = vpop.eup %1814  ;;  %v663_v29 = vmul.f32 %v1813_v19, %v2246_v41  ;;  %v679_v40 = vpack.c.bf16 %v665_v21, %v664_v34  ;;  %v1773_v19 = vld [vmem:[%s2652_s5 + $0x10] sm:$0xff]   ;;  %v1774_v21 = vld [vmem:[%s2652_s5 + $0x8] sm:$0xff]  }
 0x122   : > { %v1817_v32 = vpop.eup %1816  ;;  %1834 = vrcp.f32 %v641_v22  ;;  %v639_v35 = vadd.f32 1.0, %v1815_v23  ;;  %v1775_v22 = vld [vmem:[%s2652_s5] sm:$0xff]   ;;  %v704_v23 = vsub.s32 1, %v2222_v25 }
 0x123   : > { %v1819_v36 = vpop.eup %1818  ;;  %1836 = vrcp.f32 %v640_v18  ;;  %v678_v38 = vpack.c.bf16 %v663_v29, %v662_v26  ;;  %v668_v54 = vmul.f32 %v1817_v32, %v2250_v45 }
 0x124   : > { %v1821_v39 = vpop.eup %1820  ;;  %1838 = vrcp.f32 %v639_v35  ;;  %v644_v33 = vadd.f32 1.0, %v1819_v36  ;;  %v2339_v26 = vrot.slane %v2228_v27, %v704_v23 }
 0x125   : > { %v1823_v43 = vpop.eup %1822  ;;  %1641 = vmatprep.mubr.bf16.mxu1 %v678_v38  ;;  %v666_v51 = vmul.f32 %v1821_v39, %v2254_v49 }
 0x126   : > { %v1825_v37 = vpop.eup %1824  ;;  %v642_v44 = vadd.f32 1.0, %v1823_v43  ;;  %1642 = vmatmul.mubr.bf16.vlgmr.msra.gmra.mxu1 %v679_v40 }
 0x127   : > { %v1827_v46 = vpop.eup %1826  ;;  %v669_v41 = vmul.f32 %v1825_v37, %v2258_v53 }
 0x128   : > { %v1829_v48 = vpop.eup %1828  ;;  %v645_v50 = vadd.f32 1.0, %v1827_v46  ;;  %1840 = vrcp.f32 %v642_v44 }
 0x129   : > { %v1831_v30 = vpop.eup %1830  ;;  %v667_v52 = vmul.f32 %v1829_v48, %v2262_v57  ;;  %v681_v59 = vpack.c.bf16 %v669_v41, %v668_v54 }
 0x12a   : > { %1842 = vrcp.f32 %v645_v50  ;;  %v643_v56 = vadd.f32 1.0, %v1831_v30 }
 0x12b   : > { %1844 = vrcp.f32 %v644_v33  ;;  %v680_v58 = vpack.c.bf16 %v667_v52, %v666_v51 }
 0x12c   : > { %1846 = vrcp.f32 %v643_v56 }
 0x12d   : > { %1645 = vmatprep.mubr.bf16.mxu1 %v680_v58  ;;  %v1833_v60 = vpop.eup %1832 }
 0x12e   : > { %1646 = vmatmul.mubr.bf16.gmra.mxu1 %v681_v59  ;;  %v670_v49 = vmul.f32 %v1833_v60, %v2270_v1 }
 0x12f   : > { %v1835_v62 = vpop.eup %1834 }
 0x130   : > { %v1837_v53 = vpop.eup %1836  ;;  %v673_v0 = vmul.f32 %v1835_v62, %v2274_v16 }
 0x131   : > { %v1839_v63 = vpop.eup %1838  ;;  %v672_v45 = vmul.f32 %v1837_v53, %v2266_v61  ;;  %v1768_v61 = vld [vmem:[%s2652_s5 + $0x38] sm:$0xff]  }
 0x132   : > { %v671_v57 = vmul.f32 %v1839_v63, %v2277_v20  ;;  %1657 = vmatprep.subr.bf16.mxu0 %v1768_v61  ;;  %1689 = vmatprep.subr.bf16.mxu1 %v1768_v61 }
 0x133   : > { %v683_v3 = vpack.c.bf16 %v673_v0, %v672_v45  ;;  %1658 = vmatpush3.bf16.msra.mxu0 %v1768_v61  ;;  %1697 = vmatpush3.bf16.msra.mxu1 %v1768_v61 }
 0x134   : > { %v682_v2 = vpack.c.bf16 %v671_v57, %v670_v49 }
 0x135   : > { %v1841_v5 = vpop.eup %1840 }
 0x136   : > { %1649 = vmatprep.mubr.bf16.mxu1 %v682_v2  ;;  %v674_v17 = vmul.f32 %v1841_v5, %v2286_v42  ;;  %v1769_v42 = vld [vmem:[%s2652_s5 + $0x30] sm:$0xff]  }
 0x137   : > { %v1843_v6 = vpop.eup %1842  ;;  %1650 = vmatmul.mubr.bf16.gmra.mxu1 %v683_v3  ;;  %1659 = vmatprep.subr.bf16.mxu0 %v1769_v42 }
 0x138   : > { %v1845_v28 = vpop.eup %1844  ;;  %v677_v8 = vmul.f32 %v1843_v6, %v2289_v47  ;;  %1690 = vmatprep.subr.bf16.mxu1 %v1769_v42  ;;  %1660 = vmatpush3.bf16.msra.mxu0 %v1769_v42  ;;  %v1771_v47 = vld [vmem:[%s2652_s5 + $0x20] sm:$0xff]  }
 0x139   : > { %v1847_v7 = vpop.eup %1846  ;;  %v676_v1 = vmul.f32 %v1845_v28, %v2282_v31  ;;  %1698 = vmatpush3.bf16.msra.mxu1 %v1769_v42  ;;  %v1770_v31 = vld [vmem:[%s2652_s5 + $0x28] sm:$0xff]  }
 0x13a   : > { %v675_v16 = vmul.f32 %v1847_v7, %v2294_v55  ;;  %1661 = vmatprep.subr.bf16.mxu0 %v1770_v31  ;;  %1691 = vmatprep.subr.bf16.mxu1 %v1770_v31  ;;  %v1772_v55 = vld [vmem:[%s2652_s5 + $0x18] sm:$0xff]  }
 0x13b   : > { %v685_v20 = vpack.c.bf16 %v677_v8, %v676_v1 }
 0x13c   : > { %v684_v18 = vpack.c.bf16 %v675_v16, %v674_v17  ;;  %1662 = vmatpush3.bf16.msra.mxu0 %v1770_v31 }
 0x13d   : > { %1699 = vmatpush3.bf16.msra.mxu1 %v1770_v31  ;;  %1663 = vmatprep.subr.bf16.mxu0 %v1771_v47 }
 0x13e   : > { %1653 = vmatprep.mubr.bf16.mxu1 %v684_v18  ;;  %1692 = vmatprep.subr.bf16.mxu1 %v1771_v47 }
 0x13f   : > { %1654 = vmatmul.mubr.bf16.gmra.mxu1 %v685_v20 }
 0x140   : > { %1664 = vmatpush3.bf16.msra.mxu0 %v1771_v47 }
 0x141   : > { %1700 = vmatpush3.bf16.msra.mxu1 %v1771_v47  ;;  %1665 = vmatprep.subr.bf16.mxu0 %v1772_v55 }
 0x142   : > { %1693 = vmatprep.subr.bf16.mxu1 %v1772_v55 }
 0x144   : > { %1666 = vmatpush3.bf16.msra.mxu0 %v1772_v55 }
 0x145   : > { %1701 = vmatpush3.bf16.msra.mxu1 %v1772_v55  ;;  %1667 = vmatprep.subr.bf16.mxu0 %v1773_v19 }
 0x146   : > { %1694 = vmatprep.subr.bf16.mxu1 %v1773_v19 }
 0x148   : > { %1668 = vmatpush3.bf16.msra.mxu0 %v1773_v19 }
 0x149   : > { %1702 = vmatpush3.bf16.msra.mxu1 %v1773_v19  ;;  %1669 = vmatprep.subr.bf16.mxu0 %v1774_v21 }
 0x14a   : > { %1695 = vmatprep.subr.bf16.mxu1 %v1774_v21 }
 0x14c   : > { %1670 = vmatpush3.bf16.msra.mxu0 %v1774_v21 }
 0x14d   : > { %1703 = vmatpush3.bf16.msra.mxu1 %v1774_v21  ;;  %1671 = vmatprep.subr.bf16.mxu0 %v1775_v22 }
 0x14e   : > { %1696 = vmatprep.subr.bf16.mxu1 %v1775_v22 }
 0x150   : > { %1672 = vmatpush3.bf16.msra.mxu0 %v1775_v22 }
 0x151   : > { %1704 = vmatpush3.bf16.msra.mxu1 %v1775_v22 }
 0x1e6   : > { %v1643_v29 = vpop.f32.mrf.mxu1 }
 0x1e7   : > { %v2342_v32 = vadd.f32 %v1643_v29, %v2339_v26 }
 0x1e8   : > { %v788_v34 = vpop.f32.mrf.mxu1 }
 0x1e9   : > { %v853_v35 = vsub.f32 0.0, %v2342_v32  ;;  %v2346_v36 = vadd.f32 %v788_v34, %v2339_v26 }
 0x1ea   : > { %v1644_v38 = vpop.f32.mrf.mxu1 }
 0x1eb   : > { %v871_v39 = vmul.f32 1.442695, %v853_v35  ;;  %v851_v40 = vsub.f32 0.0, %v2346_v36  ;;  %v2350_v43 = vadd.f32 %v1644_v38, %v2339_v26 }
 0x1ec   : > { %v791_v37 = vpop.f32.mrf.mxu1 }
 0x1ed   : > { %1848 = vpow2.f32 %v871_v39  ;;  %v867_v44 = vmul.f32 1.442695, %v851_v40  ;;  %v854_v46 = vsub.f32 0.0, %v2350_v43  ;;  %v2354_v33 = vadd.f32 %v791_v37, %v2339_v26 }
 0x1ee   : > { %v1647_v48 = vpop.f32.mrf.mxu1 }
 0x1ef   : > { %1850 = vpow2.f32 %v867_v44  ;;  %v873_v41 = vmul.f32 1.442695, %v854_v46  ;;  %v852_v50 = vsub.f32 0.0, %v2354_v33  ;;  %v2358_v30 = vadd.f32 %v1647_v48, %v2339_v26 }
 0x1f0   : > { %v804_v51 = vpop.f32.mrf.mxu1 }
 0x1f1   : > { %1852 = vpow2.f32 %v873_v41  ;;  %v869_v52 = vmul.f32 1.442695, %v852_v50  ;;  %v857_v54 = vsub.f32 0.0, %v2358_v30  ;;  %v2362_v56 = vadd.f32 %v804_v51, %v2339_v26 }
 0x1f2   : > { %v1648_v58 = vpop.f32.mrf.mxu1 }
 0x1f3   : > { %1854 = vpow2.f32 %v869_v52  ;;  %v879_v59 = vmul.f32 1.442695, %v857_v54  ;;  %v855_v60 = vsub.f32 0.0, %v2362_v56  ;;  %v2366_v62 = vadd.f32 %v1648_v58, %v2339_v26 }
 0x1f4   : > { %v807_v53 = vpop.f32.mrf.mxu1 }
 0x1f5   : > { %1856 = vpow2.f32 %v879_v59  ;;  %v875_v63 = vmul.f32 1.442695, %v855_v60  ;;  %v858_v0 = vsub.f32 0.0, %v2366_v62  ;;  %v2370_v49 = vadd.f32 %v807_v53, %v2339_v26 }
 0x1f7   : > { %1858 = vpow2.f32 %v875_v63  ;;  %v881_v57 = vmul.f32 1.442695, %v858_v0  ;;  %v856_v45 = vsub.f32 0.0, %v2370_v49  ;;  %v1651_v2 = vpop.f32.mrf.mxu1 }
 0x1f8   : > { %v2374_v3 = vadd.f32 %v1651_v2, %v2339_v26 }
 0x1f9   : > { %1860 = vpow2.f32 %v881_v57  ;;  %v877_v5 = vmul.f32 1.442695, %v856_v45  ;;  %v820_v6 = vpop.f32.mrf.mxu1 }
 0x1fa   : > { %v1849_v28 = vpop.eup %1848  ;;  %v861_v7 = vsub.f32 0.0, %v2374_v3  ;;  %v2378_v8 = vadd.f32 %v820_v6, %v2339_v26 }
 0x1fb   : > { %v901_v17 = vadd.f32 1.0, %v1849_v28  ;;  %1862 = vpow2.f32 %v877_v5  ;;  %v1652_v16 = vpop.f32.mrf.mxu1 }
 0x1fc   : > { %v1851_v1 = vpop.eup %1850  ;;  %v887_v18 = vmul.f32 1.442695, %v861_v7  ;;  %v859_v20 = vsub.f32 0.0, %v2378_v8  ;;  %v2382_v61 = vadd.f32 %v1652_v16, %v2339_v26 }
 0x1fd   : > { %1864 = vrcp.f32 %v901_v17  ;;  %v899_v42 = vadd.f32 1.0, %v1851_v1  ;;  %v823_v31 = vpop.f32.mrf.mxu1 }
 0x1fe   : > { %v1853_v47 = vpop.eup %1852  ;;  %1866 = vpow2.f32 %v887_v18  ;;  %v883_v55 = vmul.f32 1.442695, %v859_v20  ;;  %v862_v19 = vsub.f32 0.0, %v2382_v61  ;;  %v2386_v21 = vadd.f32 %v823_v31, %v2339_v26 }
 0x1ff   : > { %1868 = vrcp.f32 %v899_v42  ;;  %v902_v22 = vadd.f32 1.0, %v1853_v47  ;;  %v1655_v23 = vpop.f32.mrf.mxu1 }
 0x200   : > { %v1855_v29 = vpop.eup %1854  ;;  %1870 = vpow2.f32 %v883_v55  ;;  %v889_v34 = vmul.f32 1.442695, %v862_v19  ;;  %v860_v35 = vsub.f32 0.0, %v2386_v21  ;;  %v2390_v38 = vadd.f32 %v1655_v23, %v2339_v26 }
 0x201   : > { %1872 = vrcp.f32 %v902_v22  ;;  %v900_v39 = vadd.f32 1.0, %v1855_v29  ;;  %v836_v40 = vpop.f32.mrf.mxu1 }
 0x202   : > { %v1857_v37 = vpop.eup %1856  ;;  %1874 = vpow2.f32 %v889_v34  ;;  %v885_v44 = vmul.f32 1.442695, %v860_v35  ;;  %v865_v46 = vsub.f32 0.0, %v2390_v38  ;;  %v2394_v48 = vadd.f32 %v836_v40, %v2339_v26 }
 0x203   : > { %1876 = vrcp.f32 %v900_v39  ;;  %v905_v41 = vadd.f32 1.0, %v1857_v37  ;;  %v1656_v50 = vpop.f32.mrf.mxu1 }
 0x204   : > { %v1859_v51 = vpop.eup %1858  ;;  %1878 = vpow2.f32 %v885_v44  ;;  %v895_v52 = vmul.f32 1.442695, %v865_v46  ;;  %v863_v54 = vsub.f32 0.0, %v2394_v48  ;;  %v2398_v58 = vadd.f32 %v1656_v50, %v2339_v26 }
 0x205   : > { %1880 = vrcp.f32 %v905_v41  ;;  %v903_v59 = vadd.f32 1.0, %v1859_v51  ;;  %v839_v60 = vpop.f32.mrf.mxu1 }
 0x206   : > { %v1861_v53 = vpop.eup %1860  ;;  %1882 = vpow2.f32 %v895_v52  ;;  %v891_v63 = vmul.f32 1.442695, %v863_v54  ;;  %v866_v0 = vsub.f32 0.0, %v2398_v58  ;;  %v2402_v57 = vadd.f32 %v839_v60, %v2339_v26 }
 0x207   : > { %1884 = vrcp.f32 %v903_v59  ;;  %v906_v45 = vadd.f32 1.0, %v1861_v53 }
 0x208   : > { %v1863_v2 = vpop.eup %1862  ;;  %1886 = vpow2.f32 %v891_v63  ;;  %v897_v5 = vmul.f32 1.442695, %v866_v0  ;;  %v864_v6 = vsub.f32 0.0, %v2402_v57 }
 0x209   : > { %1888 = vrcp.f32 %v906_v45  ;;  %v904_v28 = vadd.f32 1.0, %v1863_v2 }
 0x20a   : > { %v1865_v7 = vpop.eup %1864  ;;  %1890 = vpow2.f32 %v897_v5  ;;  %v893_v17 = vmul.f32 1.442695, %v864_v6 }
 0x20b   : > { %v1867_v16 = vpop.eup %1866  ;;  %1892 = vrcp.f32 %v904_v28  ;;  %v933_v35 = vmul.f32 %v1865_v7, %v2342_v32 }
 0x20c   : > { %v1869_v1 = vpop.eup %1868  ;;  %1894 = vpow2.f32 %v893_v17  ;;  %v909_v31 = vadd.f32 1.0, %v1867_v16 }
 0x20d   : > { %v1871_v18 = vpop.eup %1870  ;;  %v931_v23 = vmul.f32 %v1869_v1, %v2346_v36 }
 0x20e   : > { %v1873_v20 = vpop.eup %1872  ;;  %v907_v26 = vadd.f32 1.0, %v1871_v18 }
 0x20f   : > { %v1875_v42 = vpop.eup %1874  ;;  %v934_v55 = vmul.f32 %v1873_v20, %v2350_v43 }
 0x210   : > { %v1877_v47 = vpop.eup %1876  ;;  %v910_v19 = vadd.f32 1.0, %v1875_v42  ;;  %1896 = vrcp.f32 %v907_v26 }
 0x211   : > { %v1879_v22 = vpop.eup %1878  ;;  %v932_v29 = vmul.f32 %v1877_v47, %v2354_v33  ;;  %v948_v46 = vpack.c.bf16 %v934_v55, %v933_v35  ;;  %v1508_v47 = vld [vmem:[%s2649_s2] ss:$0 sm:$0xff]  ;;  %v298_v55 = vunpack.c.h.bf16 %v2154_v4 }
 0x212   : > { %v1881_v34 = vpop.eup %1880  ;;  %1898 = vrcp.f32 %v910_v19  ;;  %v908_v39 = vadd.f32 1.0, %v1879_v22 }
 0x213   : > { %v1883_v40 = vpop.eup %1882  ;;  %1900 = vrcp.f32 %v909_v31  ;;  %v947_v37 = vpack.c.bf16 %v932_v29, %v931_v23  ;;  %v937_v53 = vmul.f32 %v1881_v34, %v2358_v30  ;;  %v301_v23 = vunpack.c.l.bf16 %v2173_v10 }
 0x214   : > { %v1885_v44 = vpop.eup %1884  ;;  %1902 = vrcp.f32 %v908_v39  ;;  %v913_v51 = vadd.f32 1.0, %v1883_v40  ;;  %v302_v34 = vunpack.c.h.bf16 %v2173_v10  ;;  %v304_v40 = vunpack.c.h.bf16 %v2178_v11 }
 0x215   : > { %v1887_v41 = vpop.eup %1886  ;;  %1673 = vmatprep.mubr.bf16.mxu0 %v947_v37  ;;  %v935_v59 = vmul.f32 %v1885_v44, %v2362_v56  ;;  %v324_v29 = vmul.f32 %v1508_v47, %v301_v23  ;;  %v307_v10 = vunpack.c.l.bf16 %v2186_v13 }
 0x216   : > { %v1889_v43 = vpop.eup %1888  ;;  %v911_v50 = vadd.f32 1.0, %v1887_v41  ;;  %1674 = vmatmul.mubr.bf16.vlgmr.msra.gmra.mxu0 %v948_v46  ;;  %v325_v35 = vmul.f32 %v1508_v47, %v302_v34  ;;  %v327_v37 = vmul.f32 %v1508_v47, %v304_v40  ;;  %v306_v46 = vunpack.c.h.bf16 %v2181_v12 }
 0x217   : > { %v1891_v36 = vpop.eup %1890  ;;  %v938_v52 = vmul.f32 %v1889_v43, %v2366_v62  ;;  %v330_v43 = vmul.f32 %v1508_v47, %v307_v10 }
 0x218   : > { %v1893_v33 = vpop.eup %1892  ;;  %v914_v54 = vadd.f32 1.0, %v1891_v36  ;;  %1904 = vrcp.f32 %v911_v50  ;;  %v329_v41 = vmul.f32 %v1508_v47, %v306_v46  ;;  %v308_v50 = vunpack.c.h.bf16 %v2186_v13 }
 0x219   : > { %v1895_v32 = vpop.eup %1894  ;;  %v936_v60 = vmul.f32 %v1893_v33, %v2370_v49  ;;  %v950_v45 = vpack.c.bf16 %v938_v52, %v937_v53  ;;  %v310_v33 = vunpack.c.h.bf16 %v2189_v14  ;;  %v973_v13 = vsub.s32 2, %v2222_v25 }
 0x21a   : > { %1906 = vrcp.f32 %v914_v54  ;;  %v912_v63 = vadd.f32 1.0, %v1895_v32  ;;  %v331_v36 = vmul.f32 %v1508_v47, %v308_v50  ;;  %v312_v32 = vunpack.c.h.bf16 %v2194_v15 }
 0x21b   : > { %1908 = vrcp.f32 %v913_v51  ;;  %v949_v0 = vpack.c.bf16 %v936_v60, %v935_v59  ;;  %v333_v52 = vmul.f32 %v1508_v47, %v310_v33  ;;  %v2442_v60 = vrot.slane %v2228_v27, %v973_v13 }
 0x21c   : > { %1910 = vrcp.f32 %v912_v63  ;;  %v335_v59 = vmul.f32 %v1508_v47, %v312_v32 }
 0x21d   : > { %1677 = vmatprep.mubr.bf16.mxu0 %v949_v0  ;;  %v1897_v2 = vpop.eup %1896 }
 0x21e   : > { %1678 = vmatmul.mubr.bf16.gmra.mxu0 %v950_v45  ;;  %v939_v56 = vmul.f32 %v1897_v2, %v2378_v8 }
 0x21f   : > { %v1899_v5 = vpop.eup %1898 }
 0x220   : > { %v1901_v62 = vpop.eup %1900  ;;  %v942_v28 = vmul.f32 %v1899_v5, %v2382_v61 }
 0x221   : > { %v1903_v6 = vpop.eup %1902  ;;  %v941_v30 = vmul.f32 %v1901_v62, %v2374_v3  ;;  %v297_v3 = vunpack.c.l.bf16 %v2154_v4  ;;  %v303_v4 = vunpack.c.l.bf16 %v2178_v11  ;;  %v309_v11 = vunpack.c.l.bf16 %v2189_v14 }
 0x222   : > { %v940_v49 = vmul.f32 %v1903_v6, %v2386_v21 }
 0x223   : > { %v952_v17 = vpack.c.bf16 %v942_v28, %v941_v30  ;;  %v320_v19 = vmul.f32 %v1508_v47, %v297_v3  ;;  %v326_v39 = vmul.f32 %v1508_v47, %v303_v4  ;;  %v332_v51 = vmul.f32 %v1508_v47, %v309_v11 }
 0x224   : > { %v951_v7 = vpack.c.bf16 %v940_v49, %v939_v56 }
 0x225   : > { %v1905_v16 = vpop.eup %1904  ;;  %336 = vadd.xlane.f32.xlu0 %v320_v19 }
 0x226   : > { %1681 = vmatprep.mubr.bf16.mxu1 %v951_v7  ;;  %v943_v42 = vmul.f32 %v1905_v16, %v2394_v48  ;;  %v299_v48 = vunpack.c.l.bf16 %v2170_v9 }
 0x227   : > { %v1907_v1 = vpop.eup %1906  ;;  %1682 = vmatmul.mubr.bf16.vlgmr.msra.gmra.mxu1 %v952_v17 }
 0x228   : > { %v1909_v18 = vpop.eup %1908  ;;  %v946_v26 = vmul.f32 %v1907_v1, %v2398_v58  ;;  %v321_v58 = vmul.f32 %v1508_v47, %v298_v55 }
 0x229   : > { %v1911_v20 = vpop.eup %1910  ;;  %v945_v8 = vmul.f32 %v1909_v18, %v2390_v38  ;;  %v300_v38 = vunpack.c.h.bf16 %v2170_v9  ;;  %v305_v9 = vunpack.c.l.bf16 %v2181_v12  ;;  %v311_v12 = vunpack.c.l.bf16 %v2194_v15 }
 0x22a   : > { %v944_v61 = vmul.f32 %v1911_v20, %v2402_v57  ;;  %338 = vadd.xlane.f32.xlu0 %v321_v58  ;;  %v322_v57 = vmul.f32 %v1508_v47, %v299_v48 }
 0x22b   : > { %v954_v21 = vpack.c.bf16 %v946_v26, %v945_v8  ;;  %v323_v22 = vmul.f32 %v1508_v47, %v300_v38  ;;  %v328_v44 = vmul.f32 %v1508_v47, %v305_v9  ;;  %v334_v54 = vmul.f32 %v1508_v47, %v311_v12 }
 0x22c   : > { %v953_v31 = vpack.c.bf16 %v944_v61, %v943_v42 }
 0x22e   : > { %1685 = vmatprep.mubr.bf16.mxu1 %v953_v31  ;;  %340 = vadd.xlane.f32.xlu0 %v322_v57 }
 0x22f   : > { %1686 = vmatmul.mubr.bf16.gmra.mxu1 %v954_v21 }
 0x232   : > { %342 = vadd.xlane.f32.xlu0 %v323_v22 }
 0x236   : > { %344 = vadd.xlane.f32.xlu0 %v324_v29 }
 0x23a   : > { %346 = vadd.xlane.f32.xlu0 %v325_v35 }
 0x23e   : > { %348 = vadd.xlane.f32.xlu0 %v326_v39 }
 0x242   : > { %350 = vadd.xlane.f32.xlu0 %v327_v37 }
 0x246   : > { %352 = vadd.xlane.f32.xlu0 %v328_v44 }
 0x24a   : > { %354 = vadd.xlane.f32.xlu0 %v329_v41 }
 0x24e   : > { %356 = vadd.xlane.f32.xlu0 %v330_v43 }
 0x252   : > { %358 = vadd.xlane.f32.xlu0 %v331_v36 }
 0x256   : > { %360 = vadd.xlane.f32.xlu0 %v332_v51 }
 0x25a   : > { %362 = vadd.xlane.f32.xlu0 %v333_v52 }
 0x25e   : > { %364 = vadd.xlane.f32.xlu0 %v334_v54 }
 0x262   : > { %366 = vadd.xlane.f32.xlu0 %v335_v59 }
 0x2d6   : > { %v1675_v53 = vpop.f32.mrf.mxu0 }
 0x2d7   : > { %v2445_v63 = vadd.f32 %v1675_v53, %v2442_v60 }
 0x2d8   : > { %v1057_v14 = vpop.f32.mrf.mxu0 }
 0x2d9   : > { %v1122_v0 = vsub.f32 0.0, %v2445_v63  ;;  %v2449_v45 = vadd.f32 %v1057_v14, %v2442_v60 }
 0x2da   : > { %v1676_v2 = vpop.f32.mrf.mxu0 }
 0x2db   : > { %v1140_v5 = vmul.f32 1.442695, %v1122_v0  ;;  %v1120_v15 = vsub.f32 0.0, %v2449_v45  ;;  %v2453_v62 = vadd.f32 %v1676_v2, %v2442_v60 }
 0x2dc   : > { %v1060_v6 = vpop.f32.mrf.mxu0 }
 0x2dd   : > { %1912 = vpow2.f32 %v1140_v5  ;;  %v1136_v27 = vmul.f32 1.442695, %v1120_v15  ;;  %v1123_v28 = vsub.f32 0.0, %v2453_v62  ;;  %v2457_v56 = vadd.f32 %v1060_v6, %v2442_v60  ;;  %v2498_v5 = vld [vmem:[%s2653_s6] ss:$0 sm:$0xff] }
 0x2de   : > { %v1679_v49 = vpop.f32.mrf.mxu0 }
 0x2df   : > { %1914 = vpow2.f32 %v1136_v27  ;;  %v1142_v30 = vmul.f32 1.442695, %v1123_v28  ;;  %v1121_v7 = vsub.f32 0.0, %v2457_v56  ;;  %v2461_v17 = vadd.f32 %v1679_v49, %v2442_v60 }
 0x2e0   : > { %v1073_v16 = vpop.f32.mrf.mxu0 }
 0x2e1   : > { %1916 = vpow2.f32 %v1142_v30  ;;  %v1138_v1 = vmul.f32 1.442695, %v1121_v7  ;;  %v1126_v18 = vsub.f32 0.0, %v2461_v17  ;;  %v2465_v20 = vadd.f32 %v1073_v16, %v2442_v60 }
 0x2e2   : > { %v1680_v26 = vpop.f32.mrf.mxu0 }
 0x2e3   : > { %1918 = vpow2.f32 %v1138_v1  ;;  %v1148_v42 = vmul.f32 1.442695, %v1126_v18  ;;  %v1124_v61 = vsub.f32 0.0, %v2465_v20  ;;  %v2469_v8 = vadd.f32 %v1680_v26, %v2442_v60 }
 0x2e4   : > { %v1076_v31 = vpop.f32.mrf.mxu0 }
 0x2e5   : > { %1920 = vpow2.f32 %v1148_v42  ;;  %v1144_v21 = vmul.f32 1.442695, %v1124_v61  ;;  %v1127_v3 = vsub.f32 0.0, %v2469_v8  ;;  %v2473_v47 = vadd.f32 %v1076_v31, %v2442_v60 }
 0x2e7   : > { %v1683_v55 = vpop.f32.mrf.mxu1  ;;  %v1150_v19 = vmul.f32 1.442695, %v1127_v3  ;;  %v1125_v58 = vsub.f32 0.0, %v2473_v47  ;;  %1922 = vpow2.f32 %v1144_v21 }
 0x2e8   : > { %v2477_v48 = vadd.f32 %v1683_v55, %v2442_v60 }
 0x2e9   : > { %v1089_v57 = vpop.f32.mrf.mxu1  ;;  %1924 = vpow2.f32 %v1150_v19  ;;  %v1146_v34 = vmul.f32 1.442695, %v1125_v58 }
 0x2ea   : > { %v1913_v38 = vpop.eup %1912  ;;  %v1130_v35 = vsub.f32 0.0, %v2477_v48  ;;  %v2481_v4 = vadd.f32 %v1089_v57, %v2442_v60 }
 0x2eb   : > { %v1170_v22 = vadd.f32 1.0, %v1913_v38  ;;  %v1684_v23 = vpop.f32.mrf.mxu1 }
 0x2ec   : > { %v1915_v29 = vpop.eup %1914  ;;  %v1156_v46 = vmul.f32 1.442695, %v1130_v35  ;;  %v1128_v41 = vsub.f32 0.0, %v2481_v4  ;;  %v2485_v10 = vadd.f32 %v1684_v23, %v2442_v60 }
 0x2ed   : > { %1926 = vrcp.f32 %v1170_v22  ;;  %v1168_v39 = vadd.f32 1.0, %v1915_v29  ;;  %v1092_v40 = vpop.f32.mrf.mxu1 }
 0x2ee   : > { %v1917_v37 = vpop.eup %1916  ;;  %v1152_v11 = vmul.f32 1.442695, %v1128_v41  ;;  %v1131_v51 = vsub.f32 0.0, %v2485_v10  ;;  %v2489_v33 = vadd.f32 %v1092_v40, %v2442_v60 }
 0x2ef   : > { %1928 = vrcp.f32 %v1168_v39  ;;  %v1171_v9 = vadd.f32 1.0, %v1917_v37  ;;  %v1687_v50 = vpop.f32.mrf.mxu1 }
 0x2f0   : > { %v1919_v44 = vpop.eup %1918  ;;  %1930 = vpow2.f32 %v1146_v34  ;;  %v1158_v32 = vmul.f32 1.442695, %v1131_v51  ;;  %v1129_v59 = vsub.f32 0.0, %v2489_v33  ;;  %v2493_v13 = vadd.f32 %v1687_v50, %v2442_v60 }
 0x2f1   : > { %1932 = vrcp.f32 %v1171_v9  ;;  %v1169_v43 = vadd.f32 1.0, %v1919_v44  ;;  %v1105_v12 = vpop.f32.mrf.mxu1 }
 0x2f2   : > { %v1921_v36 = vpop.eup %1920  ;;  %1934 = vpow2.f32 %v1156_v46  ;;  %v1154_v27 = vmul.f32 1.442695, %v1129_v59  ;;  %v1134_v28 = vsub.f32 0.0, %v2493_v13  ;;  %v2503_v49 = vadd.f32 %v1105_v12, %v2442_v60 }
 0x2f3   : > { %1936 = vrcp.f32 %v1169_v43  ;;  %v1174_v52 = vadd.f32 1.0, %v1921_v36  ;;  %v1688_v0 = vpop.f32.mrf.mxu1 }
 0x2f4   : > { %v1923_v54 = vpop.eup %1922  ;;  %1938 = vpow2.f32 %v1152_v11  ;;  %v1132_v42 = vsub.f32 0.0, %v2503_v49  ;;  %v2514_v58 = vadd.f32 %v1688_v0, %v2442_v60 }
 0x2f5   : > { %1940 = vrcp.f32 %v1174_v52  ;;  %v1172_v14 = vadd.f32 1.0, %v1923_v54  ;;  %v1108_v1 = vpop.f32.mrf.mxu1 }
 0x2f6   : > { %v1925_v53 = vpop.eup %1924  ;;  %1942 = vpow2.f32 %v1158_v32  ;;  %v2509_v61 = vadd.f32 %v1108_v1, %v2442_v60  ;;  %v1160_v19 = vmul.f32 1.442695, %v1132_v42  ;;  %v1135_v34 = vsub.f32 0.0, %v2514_v58 }
 0x2f7   : > { %1944 = vrcp.f32 %v1172_v14  ;;  %v1175_v16 = vadd.f32 1.0, %v1925_v53 }
 0x2f8   : > { %1946 = vpow2.f32 %v1154_v27  ;;  %v1133_v57 = vsub.f32 0.0, %v2509_v61 }
 0x2f9   : > { %1948 = vrcp.f32 %v1175_v16 }
 0x2fa   : > { %v1927_v2 = vpop.eup %1926  ;;  %v1162_v35 = vmul.f32 1.442695, %v1133_v57  ;;  %v337_v57 = vpop.xlane.xlu0 %336 }
 0x2fb   : > { %v1202_v15 = vmul.f32 %v1927_v2, %v2445_v63  ;;  %v1164_v63 = vmul.f32 1.442695, %v1134_v28 }
 0x2fc   : > { %v1929_v6 = vpop.eup %1928 }
 0x2fd   : > { %v1931_v30 = vpop.eup %1930  ;;  %v1200_v7 = vmul.f32 %v1929_v6, %v2449_v45  ;;  %v1225_v18 = vmul.f32 %v2498_v5, %v1202_v15  ;;  %1950 = vpow2.f32 %v1164_v63 }
 0x2fe   : > { %v1933_v26 = vpop.eup %1932  ;;  %v1173_v3 = vadd.f32 1.0, %v1931_v30 }
 0x2ff   : > { %1243 = vadd.xlane.f32.xlu1 %v1225_v18  ;;  %v1935_v31 = vpop.eup %1934  ;;  %v1203_v21 = vmul.f32 %v1933_v26, %v2453_v62  ;;  %v1223_v45 = vmul.f32 %v2498_v5, %v1200_v7 }
 0x300   : > { %v1937_v55 = vpop.eup %1936  ;;  %1952 = vrcp.f32 %v1173_v3  ;;  %v1178_v23 = vadd.f32 1.0, %v1935_v31 }
 0x301   : > { %v1939_v38 = vpop.eup %1938  ;;  %v1201_v22 = vmul.f32 %v1937_v55, %v2457_v56  ;;  %v1226_v62 = vmul.f32 %v2498_v5, %v1203_v21  ;;  %1954 = vpow2.f32 %v1160_v19  ;;  %v1166_v56 = vmul.f32 1.442695, %v1135_v34 }
 0x302   : > { %v1941_v29 = vpop.eup %1940  ;;  %1956 = vrcp.f32 %v1178_v23  ;;  %v1176_v60 = vadd.f32 1.0, %v1939_v38 }
 0x303   : > { %1239 = vadd.xlane.f32.xlu1 %v1223_v45  ;;  %v1943_v39 = vpop.eup %1942  ;;  %v1206_v40 = vmul.f32 %v1941_v29, %v2461_v17  ;;  %v1224_v37 = vmul.f32 %v2498_v5, %v1201_v22  ;;  %1958 = vpow2.f32 %v1162_v35 }
 0x304   : > { %v1945_v9 = vpop.eup %1944  ;;  %1960 = vrcp.f32 %v1176_v60  ;;  %v1179_v41 = vadd.f32 1.0, %v1943_v39 }
 0x305   : > { %v1947_v44 = vpop.eup %1946  ;;  %v1204_v46 = vmul.f32 %v1945_v9, %v2465_v20  ;;  %v1229_v43 = vmul.f32 %v2498_v5, %v1206_v40  ;;  %1962 = vpow2.f32 %v1166_v56 }
 0x306   : > { %v1949_v50 = vpop.eup %1948  ;;  %1964 = vrcp.f32 %v1179_v41  ;;  %v1177_v11 = vadd.f32 1.0, %v1947_v44 }
 0x307   : > { %1245 = vadd.xlane.f32.xlu1 %v1226_v62  ;;  %v1207_v17 = vmul.f32 %v1949_v50, %v2469_v8  ;;  %v1227_v51 = vmul.f32 %v2498_v5, %v1204_v46 }
 0x308   : > { %1966 = vrcp.f32 %v1177_v11 }
 0x309   : > { %v1230_v32 = vmul.f32 %v2498_v5, %v1207_v17 }
 0x30a   : > { %v1951_v36 = vpop.eup %1950 }
 0x30b   : > { %1241 = vadd.xlane.f32.xlu1 %v1224_v37  ;;  %v1182_v20 = vadd.f32 1.0, %v1951_v36  ;;  %v2551_v36 = vstv %s1287_s22 }
 0x30d   : > { %v1953_v52 = vpop.eup %1952  ;;  %1968 = vrcp.f32 %v1182_v20 }
 0x30e   : > { %v1955_v12 = vpop.eup %1954  ;;  %v1205_v54 = vmul.f32 %v1953_v52, %v2473_v47 }
 0x30f   : > { %1251 = vadd.xlane.f32.xlu1 %v1229_v43  ;;  %v1957_v59 = vpop.eup %1956  ;;  %v1180_v8 = vadd.f32 1.0, %v1955_v12 }
 0x310   : > { %v1959_v53 = vpop.eup %1958  ;;  %v1210_v14 = vmul.f32 %v1957_v59, %v2477_v48  ;;  %v1228_v0 = vmul.f32 %v2498_v5, %v1205_v54 }
 0x311   : > { %v1961_v2 = vpop.eup %1960  ;;  %1970 = vrcp.f32 %v1180_v8  ;;  %v1181_v47 = vadd.f32 1.0, %v1959_v53 }
 0x312   : > { %v1963_v15 = vpop.eup %1962  ;;  %v1208_v6 = vmul.f32 %v1961_v2, %v2481_v4  ;;  %v1233_v27 = vmul.f32 %v2498_v5, %v1210_v14 }
 0x313   : > { %1247 = vadd.xlane.f32.xlu1 %v1227_v51  ;;  %v1965_v28 = vpop.eup %1964  ;;  %v1183_v7 = vadd.f32 1.0, %v1963_v15  ;;  %1972 = vrcp.f32 %v1181_v47 }
 0x314   : > { %v1211_v30 = vmul.f32 %v1965_v28, %v2485_v10  ;;  %v1231_v48 = vmul.f32 %v2498_v5, %v1208_v6 }
 0x315   : > { %v1967_v16 = vpop.eup %1966  ;;  %1974 = vrcp.f32 %v1183_v7 }
 0x316   : > { %v1209_v1 = vmul.f32 %v1967_v16, %v2489_v33  ;;  %v1234_v18 = vmul.f32 %v2498_v5, %v1211_v30 }
 0x317   : > { %1253 = vadd.xlane.f32.xlu1 %v1230_v32 }
 0x318   : > { %v1232_v63 = vmul.f32 %v2498_v5, %v1209_v1 }
 0x31a   : > { %v1969_v4 = vpop.eup %1968 }
 0x31b   : > { %1249 = vadd.xlane.f32.xlu1 %v1228_v0  ;;  %v1214_v26 = vmul.f32 %v1969_v4, %v2493_v13 }
 0x31d   : > { %v1237_v31 = vmul.f32 %v2498_v5, %v1214_v26 }
 0x31e   : > { %v1971_v42 = vpop.eup %1970 }
 0x31f   : > { %1259 = vadd.xlane.f32.xlu1 %v1233_v27  ;;  %v1212_v10 = vmul.f32 %v1971_v42, %v2503_v49  ;;  %v339_v49 = vpop.xlane.xlu0 %338 }
 0x320   : > { %v1973_v21 = vpop.eup %1972 }
 0x321   : > { %v1213_v3 = vmul.f32 %v1973_v21, %v2509_v61  ;;  %v1235_v33 = vmul.f32 %v2498_v5, %v1212_v10 }
 0x322   : > { %v1975_v45 = vpop.eup %1974 }
 0x323   : > { %1255 = vadd.xlane.f32.xlu1 %v1231_v48  ;;  %v1215_v55 = vmul.f32 %v1975_v45, %v2514_v58  ;;  %v1236_v13 = vmul.f32 %v2498_v5, %v1213_v3  ;;  %v341_v38 = vpop.xlane.xlu0 %340 }
 0x325   : > { %v1238_v19 = vmul.f32 %v2498_v5, %v1215_v55  ;;  %v2546_v5 = vand.u32 127, %v385_v24 }
 0x327   : > { %1261 = vadd.xlane.f32.xlu1 %v1234_v18  ;;  %v343_v22 = vpop.xlane.xlu0 %342  ;;  %v1327_v44 = vadd.s32 4294967288, %v2546_v5  ;;  %v1334_v51 = vadd.s32 4294967280, %v2546_v5  ;;  %v1325_v24 = vsub.s32 %v2546_v5, %v2222_v25  ;;  %v1341_v20 = vadd.s32 4294967272, %v2546_v5 }
 0x328   : > { %v1348_v32 = vadd.s32 4294967264, %v2546_v5  ;;  %v1355_v8 = vadd.s32 4294967256, %v2546_v5  ;;  %v1362_v26 = vadd.s32 4294967248, %v2546_v5  ;;  %v1369_v10 = vadd.s32 4294967240, %v2546_v5 }
 0x329   : > { %v1330_v17 = vsub.s32 %v1327_v44, %v2222_v25  ;;  %v1337_v15 = vsub.s32 %v1334_v51, %v2222_v25  ;;  %v1344_v28 = vsub.s32 %v1341_v20, %v2222_v25  ;;  %v1390_v44 = vadd.s32 4294967216, %v2546_v5 }
 0x32a   : > { %v1351_v30 = vsub.s32 %v1348_v32, %v2222_v25  ;;  %v1358_v1 = vsub.s32 %v1355_v8, %v2222_v25 }
 0x32b   : > { %1257 = vadd.xlane.f32.xlu1 %v1232_v63  ;;  %v345_v23 = vpop.xlane.xlu0 %344 }
 0x32f   : > { %1267 = vadd.xlane.f32.xlu1 %v1237_v31  ;;  %v347_v62 = vpop.xlane.xlu0 %346 }
 0x333   : > { %1263 = vadd.xlane.f32.xlu1 %v1235_v33  ;;  %v349_v34 = vpop.xlane.xlu0 %348  ;;  %v1376_v33 = vadd.s32 4294967232, %v2546_v5 }
 0x337   : > { %1265 = vadd.xlane.f32.xlu1 %v1236_v13  ;;  %v351_v39 = vpop.xlane.xlu0 %350 }
 0x33b   : > { %1269 = vadd.xlane.f32.xlu1 %v1238_v19  ;;  %v353_v58 = vpop.xlane.xlu0 %352 }
 0x33f   : > { %v355_v9 = vpop.xlane.xlu0 %354 }
 0x343   : > { %v2549_v50 = vpop.xlane.xlu0 %356 }
 0x347   : > { %v359_v2 = vpop.xlane.xlu0 %358 }
 0x34b   : > { %v361_v31 = vpop.xlane.xlu0 %360 }
 0x388   : > { %v1244_v29 = vpop.xlane.xlu1 %1243 }
 0x389   : > { %v1273_v52 = vadd.f32 %v1244_v29, %v341_v38 }
 0x38b   : > { %v1291_v6 = vadd.f32 %v2551_v36, %v1273_v52 }
 0x38c   : > { %v1240_v61 = vpop.xlane.xlu1 %1239 }
 0x38d   : > { %v1271_v43 = vadd.f32 %v1240_v61, %v337_v57  ;;  %v1338_v4 = vrot.slane %v1291_v6, %v1337_v15  ;;  %v1383_v57 = vadd.s32 4294967224, %v2546_v5 }
 0x38f   : > { %v1289_v54 = vadd.f32 %v2551_v36, %v1271_v43 }
 0x390   : > { %v1246_v35 = vpop.xlane.xlu1 %1245 }
 0x391   : > { %v1274_v53 = vadd.f32 %v1246_v35, %v343_v22  ;;  %v1326_v27 = vrot.slane %v1289_v54, %v1325_v24  ;;  %v1393_v54 = vsub.s32 %v1390_v44, %v2222_v25 }
 0x393   : > { %v1292_v48 = vadd.f32 %v2551_v36, %v1274_v53  ;;  %v1411_v53 = vadd.s32 4294967192, %v2546_v5 }
 0x394   : > { %v1242_v40 = vpop.xlane.xlu1 %1241 }
 0x395   : > { %v1272_v46 = vadd.f32 %v1242_v40, %v339_v49  ;;  %v1345_v55 = vrot.slane %v1292_v48, %v1344_v28  ;;  %v1365_v49 = vsub.s32 %v1362_v26, %v2222_v25 }
 0x397   : > { %v1290_v11 = vadd.f32 %v2551_v36, %v1272_v46 }
 0x398   : > { %v1252_v60 = vpop.xlane.xlu1 %1251 }
 0x399   : > { %v1331_v14 = vrot.slane %v1290_v11, %v1330_v17  ;;  %v1277_v63 = vadd.f32 %v1252_v60, %v349_v34  ;;  %v1379_v34 = vsub.s32 %v1376_v33, %v2222_v25  ;;  %v1386_v60 = vsub.s32 %v1383_v57, %v2222_v25 }
 0x39a   : > { %v1397_v17 = vadd.s32 4294967208, %v2546_v5  ;;  %v1404_v11 = vadd.s32 4294967200, %v2546_v5 }
 0x39b   : > { %v1333_v16 = vsel %vm1332_vm0, %v1331_v14, %v1326_v27  ;;  %v1295_v38 = vadd.f32 %v2551_v36, %v1277_v63  ;;  %v1418_v27 = vadd.s32 4294967184, %v2546_v5 }
 0x39c   : > { %v1248_v37 = vpop.xlane.xlu1 %1247  ;;  %v1340_v21 = vsel %vm1339_vm1, %v1338_v4, %v1333_v16  ;;  %v1400_v8 = vsub.s32 %v1397_v17, %v2222_v25  ;;  %v1425_v16 = vadd.s32 4294967176, %v2546_v5 }
 0x39d   : > { %v1275_v59 = vadd.f32 %v1248_v37, %v345_v23  ;;  %v1347_v23 = vsel %vm1346_vm2, %v1345_v55, %v1340_v21  ;;  %v363_v37 = vpop.xlane.xlu0 %362 }
 0x39e   : > { %v1428_v5 = vsub.s32 %v1425_v16, %v2222_v25 }
 0x39f   : > { %v1293_v7 = vadd.f32 %v2551_v36, %v1275_v59 }
 0x3a0   : > { %v1254_v56 = vpop.xlane.xlu1 %1253 }
 0x3a1   : > { %v1352_v3 = vrot.slane %v1293_v7, %v1351_v30  ;;  %v1278_v13 = vadd.f32 %v1254_v56, %v351_v39  ;;  %v1366_v56 = vrot.slane %v1295_v38, %v1365_v49  ;;  %v1414_v7 = vsub.s32 %v1411_v53, %v2222_v25 }
 0x3a3   : > { %v1354_v61 = vsel %vm1353_vm3, %v1352_v3, %v1347_v23  ;;  %v1296_v39 = vadd.f32 %v2551_v36, %v1278_v13 }
 0x3a4   : > { %v1250_v41 = vpop.xlane.xlu1 %1249 }
 0x3a5   : > { %v1276_v0 = vadd.f32 %v1250_v41, %v347_v62  ;;  %v1372_v62 = vsub.s32 %v1369_v10, %v2222_v25 }
 0x3a7   : > { %v1294_v18 = vadd.f32 %v2551_v36, %v1276_v0  ;;  %v1373_v51 = vrot.slane %v1296_v39, %v1372_v62  ;;  %v1407_v0 = vsub.s32 %v1404_v11, %v2222_v25 }
 0x3a8   : > { %v1260_v12 = vpop.xlane.xlu1 %1259 }
 0x3a9   : > { %v1359_v19 = vrot.slane %v1294_v18, %v1358_v1 }
 0x3ab   : > { %v1361_v40 = vsel %vm1360_vm4, %v1359_v19, %v1354_v61 }
 0x3ac   : > { %v1256_v47 = vpop.xlane.xlu1 %1255  ;;  %v1368_v41 = vsel %vm1367_vm5, %v1366_v56, %v1361_v40 }
 0x3ad   : > { %v1279_v45 = vadd.f32 %v1256_v47, %v353_v58  ;;  %v1375_v59 = vsel %vm1374_vm6, %v1373_v51, %v1368_v41 }
 0x3af   : > { %v1297_v35 = vadd.f32 %v2551_v36, %v1279_v45 }
 0x3b0   : > { %v1262_v42 = vpop.xlane.xlu1 %1261 }
 0x3b1   : > { %v1380_v43 = vrot.slane %v1297_v35, %v1379_v34  ;;  %v1282_v52 = vadd.f32 %v1262_v42, %v359_v2  ;;  %v1421_v42 = vsub.s32 %v1418_v27, %v2222_v25 }
 0x3b3   : > { %v1382_v14 = vsel %vm1381_vm7, %v1380_v43, %v1375_v59  ;;  %v1300_v2 = vadd.f32 %v2551_v36, %v1282_v52 }
 0x3b4   : > { %v1258_v22 = vpop.xlane.xlu1 %1257 }
 0x3b5   : > { %v1280_v29 = vadd.f32 %v1258_v22, %v355_v9  ;;  %v1281_v9 = vadd.f32 %v1260_v12, %v2549_v50  ;;  %v365_v50 = vpop.xlane.xlu0 %364  ;;  %v1401_v26 = vrot.slane %v1300_v2, %v1400_v8 }
 0x3b7   : > { %v1298_v58 = vadd.f32 %v2551_v36, %v1280_v29  ;;  %v1299_v20 = vadd.f32 %v2551_v36, %v1281_v9 }
 0x3b8   : > { %v1268_v46 = vpop.xlane.xlu1 %1267 }
 0x3b9   : > { %v1387_v24 = vrot.slane %v1298_v58, %v1386_v60  ;;  %v1394_v47 = vrot.slane %v1299_v20, %v1393_v54  ;;  %v1285_v28 = vadd.f32 %v1268_v46, %v365_v50  ;;  %v367_v4 = vpop.xlane.xlu0 %366 }
 0x3bb   : > { %v1389_v15 = vsel %vm1388_vm8, %v1387_v24, %v1382_v14  ;;  %v1303_v10 = vadd.f32 %v2551_v36, %v1285_v28 }
 0x3bc   : > { %v1264_v32 = vpop.xlane.xlu1 %1263  ;;  %v1396_v1 = vsel %vm1395_vm9, %v1394_v47, %v1389_v15 }
 0x3bd   : > { %v1283_v12 = vadd.f32 %v1264_v32, %v361_v31  ;;  %v1403_v21 = vsel %vm1402_vm10, %v1401_v26, %v1396_v1  ;;  %v1422_v19 = vrot.slane %v1303_v10, %v1421_v42 }
 0x3bf   : > { %v1301_v6 = vadd.f32 %v2551_v36, %v1283_v12 }
 0x3c0   : > { %v1266_v30 = vpop.xlane.xlu1 %1265 }
 0x3c1   : > { %v1284_v48 = vadd.f32 %v1266_v30, %v363_v37  ;;  %v1408_v18 = vrot.slane %v1301_v6, %v1407_v0 }
 0x3c3   : > { %v1302_v63 = vadd.f32 %v2551_v36, %v1284_v48  ;;  %v1410_v45 = vsel %vm1409_vm11, %v1408_v18, %v1403_v21 }
 0x3c4   : > { %v1270_v31 = vpop.xlane.xlu1 %1269 }
 0x3c5   : > { %v1415_v3 = vrot.slane %v1302_v63, %v1414_v7  ;;  %v1286_v33 = vadd.f32 %v1270_v31, %v367_v4 }
 0x3c7   : > { %v1304_v55 = vadd.f32 %v2551_v36, %v1286_v33  ;;  %v1417_v13 = vsel %vm1416_vm12, %v1415_v3, %v1410_v45 }
 0x3c8   : > { %v1424_v49 = vsel %vm1423_vm13, %v1422_v19, %v1417_v13 }
 0x3c9   : > { %v1429_v57 = vrot.slane %v1304_v55, %v1428_v5 }
 0x3cb   : > { %v1431_v25 = vsel %vm1430_vm14, %v1429_v57, %v1424_v49 }
 0x3cc   : > { %1433 = vst [vmem:[%s273_s24] sm:$0x1] %v1431_v25 }
 0x3cd   : > { %1989 = shalt.err (!%p1986_p3)
}
 0x3ce   : > { %s1990_s20 = scalar_lea.hbm %s2610_s28, 16  ;;  %s1994_s22 = scalar_lea.hbm %s2655_s8, 32 }
 0x3cf   : > { %p1991_p4 = scmp.ne.s32.totalorder %s2610_s28, %s1990_s20  ;;  %p1995_p9 = scmp.lt.s32.totalorder %s2610_s28, %s2655_s8 }
 0x3d0   : > { %p1996_p10 = scmp.lt.s32.totalorder %s1994_s22, %s1990_s20 }
 0x3d1   : > { %p1992_p7 = pnand %p1991_p4, %p2122_p5 }
 0x3d2   : > { %p1997_p11 = por %p1996_p10, %p1995_p9 }
 0x3d3   : > { %p1993_p8 = pneg %p1992_p7 }
 0x3d5   : > { %p1998_p12 = pnand %p1997_p11, %p1993_p8 }
 0x3d7   : > { %2001 = shalt.err (!%p1998_p12)
}
 0x3d8   : > { %1705 = dma.vmem_to_hbm [thread:$0]  (%p2122_p5), %s1448_s25, 16, %s2610_s28, %s1435_s11  }
 0x3d9 PF: > { %p1711_p13 = scmp.ge.s32.totalorder %s2036_s10, 2  ;;  %s1459_s26 = sand.u32 1, %s2024_s29  }
 0x3da   : > { %s1460_s27 = scalar_lea.sflag [#allocation5], %s1459_s26 }
 0x3db   : > { %p1708_p0 = pnand %p1711_p13, %p2126_p6 }
 0x3dd   : > { %p1709_p1 = pneg %p1708_p0 }
 0x3df   : > { %2019 = dma.done.wait (%p1709_p1), %s1460_s27, 16  }
 0x3e0   : > { %2021 = vsyncadd (%p1709_p1), %s1460_s27, 4294967280  ;;  %p19_p2 = scmp.ge.s32.totalorder %s2110_s12, 4   ;;  %s2658_s29 = smov %s2028_s30 }
 0x3e1   : > { %s2659_s30 = smov %s2032_s9  ;;  %s2660_s9 = smov %s2120_s15 }
 0x3e2   : > { %s2661_s10 = smov %s2110_s12  ;;  %21 = sbr.rel (!%p19_p2) target bundleno = 5 (0x5), region = 83 }
 0x3e7   :  { %1464 = vsyncpa [#allocation5], 1 }
 0x3e8   :  { %1466 = vsyncpa [#allocation5 + $0x1], 1 }

// kernel: ebm_forward.1
= control target key start
LH: loop header
LB: loop body
LE: loop exit
PB: predicated region body
PF: predicated region fallthrough
CT: control target
= control target key end

     0   :  { %s2647_s0 = inlined_call_operand.<no memory space> [shape: f32[1], index: 0, kind: input, shape index: {}]   ;;  %s2648_s1 = inlined_call_operand.vmem [shape: bf16[256,128], index: 1, kind: input, shape index: {}]   ;;  %s2649_s2 = inlined_call_operand.vmem [shape: f32[1,128], index: 2, kind: input, shape index: {}]   ;;  %s2650_s3 = inlined_call_operand.vmem [shape: bf16[128,128], index: 3, kind: input, shape index: {}]   ;;  %s2651_s4 = inlined_call_operand.vmem [shape: bf16[128,128], index: 4, kind: input, shape index: {}]   ;;  %s2652_s5 = inlined_call_operand.vmem [shape: bf16[128,128], index: 5, kind: input, shape index: {}]   ;;  %s2653_s6 = inlined_call_operand.vmem [shape: f32[1,128], index: 6, kind: input, shape index: {}]   ;;  %s2654_s7 = inlined_call_operand.vmem [shape: f32[3,128], index: 7, kind: input, shape index: {}]   ;;  %s2655_s8 = inlined_call_operand.hbm [shape: f32[1,256], index: 8, kind: output, shape index: {}]  }
   0x1   :  { %13 = sst [smem:[#allocation3]] %s2647_s0 }
   0x2   :  { %14 = vsyncpa [#allocation5], 0 }
   0x3   :  { %16 = vsyncpa [#allocation5 + $0x1], 0  ;;  %s2087_s29 = smov 0   ;;  %s2089_s30 = smov 0  }
   0x4   :  { %s2091_s9 = smov 0   ;;  %s2093_s10 = smov 0  }
   0x5 LB: > { %s1501_s0 = sadd.s32 4294967295, %s2036_s10   ;;  %s1502_s11 = sadd.s32 4294967294, %s2036_s10   ;;  %s2036_s10 = sphi %s2093_s10, %s2661_s10   ;;  %s2032_s9 = sphi %s2091_s9, %s2660_s9   ;;  %s2028_s30 = sphi %s2089_s30, %s2659_s30   ;;  %s2024_s29 = sphi %s2087_s29, %s2658_s29  }
   0x6   : > { %s2110_s12 = sadd.s32 1, %s2036_s10   ;;  %s181_s13 = sadd.s32 1, %s2032_s9 }
   0x7   : > { %s178_s14 = ssub.s32 %s2036_s10, %s2110_s12  ;;  %p191_p0 = scmp.ne.s32.totalorder %s2032_s9, %s2028_s30 }
   0x8   : > { %p179_p1 = scmp.eq.s32.totalorder %s178_s14, 0  ;;  %p192_p2 = scmp.eq.s32.totalorder %s1501_s0, 1 }
   0x9   : > { %p197_p3 = scmp.ne.s32.totalorder %s2028_s30, %s2024_s29  ;;  %p198_p4 = scmp.eq.s32.totalorder %s1502_s11, 1 }
   0xa   : > { %s2120_s15 = scalar_select %p179_p1, %s2032_s9, %s181_s13  }
   0xb   : > { %p2122_p5 = por %p192_p2, %p191_p0  ;;  %p2126_p6 = por %p198_p4, %p197_p3 }
   0xc   : > { %p1505_p7 = scmp.ge.s32.totalorder %s2036_s10, 1  ;;  %p243_p8 = scmp.lt.s32.totalorder %s2036_s10, 3 }
   0xe   : > { %p244_p9 = pnand %p1505_p7, %p243_p8 }
   0xf   : > { %s2135_s20 = sshll.u32 (!%p244_p9), %s1501_s0, 4  ;;  %s1287_s22 = sld [smem:[#allocation3]] (!%p244_p9) }
  0x10   : > { %247 = sbr.rel (%p244_p9) target bundleno = 985 (0x3d9), region = 48  ;;  %p275_p10 = scmp.lt.s32.totalorder (!%p244_p9), %s2135_s20, 31 }
  0x11   : > { %s2610_s28 = scalar_lea.hbm (!%p244_p9), %s2655_s8, %s2135_s20  ;;  %s2038_s14 = smov (!%p244_p9), [#allocation4]  }
  0x15   : > { %v1744_v0 = vld [vmem:[%s2650_s3 + $0x38] sm:$0xff]   ;;  %v1745_v1 = vld [vmem:[%s2650_s3 + $0x30] sm:$0xff]   ;;  %s276_s23 = scalar_select %p275_p10, %s2135_s20, 31  ;;  %v1746_v2 = vld [vmem:[%s2650_s3 + $0x28] sm:$0xff]   ;;  %v385_v24 = vlaneseq  ;;  %vm1332_vm0 = vcmask 130112   ;;  %vm1339_vm1 = vcmask 195712  }
  0x16   : > { %1593 = vmatprep.subr.bf16.mxu0 %v1744_v0  ;;  %v1747_v3 = vld [vmem:[%s2650_s3 + $0x20] sm:$0xff]   ;;  %v1748_v5 = vld [vmem:[%s2650_s3 + $0x18] sm:$0xff]   ;;  %v1749_v6 = vld [vmem:[%s2650_s3 + $0x10] sm:$0xff]   ;;  %vm1346_vm2 = vcmask 261312   ;;  %vm1353_vm3 = vcmask 326912   ;;  %vm1360_vm4 = vcmask 392512  }
  0x17   : > { %1594 = vmatpush3.bf16.msra.mxu0 %v1744_v0  ;;  %s1507_s26 = sshll.u32 %s276_s23, 2  ;;  %v1750_v7 = vld [vmem:[%s2650_s3 + $0x8] sm:$0xff]   ;;  %v1751_v8 = vld [vmem:[%s2650_s3] sm:$0xff]   ;;  %v1760_v16 = vld [vmem:[%s2651_s4 + $0x38] sm:$0xff]   ;;  %v2222_v25 = vshrl.u32 %v385_v24, 7  ;;  %vm1367_vm5 = vcmask 458112  }
  0x18   : > { %1595 = vmatprep.subr.bf16.mxu0 %v1745_v1  ;;  %s2148_s0 = scalar_lea.vmem %s2648_s1, %s1507_s26  ;;  %1625 = vmatprep.subr.bf16.mxu1 %v1760_v16  ;;  %v1761_v17 = vld [vmem:[%s2651_s4 + $0x30] sm:$0xff]   ;;  %v1762_v18 = vld [vmem:[%s2651_s4 + $0x28] sm:$0xff]   ;;  %v1763_v19 = vld [vmem:[%s2651_s4 + $0x20] sm:$0xff]   ;;  %vm1374_vm6 = vcmask 523712   ;;  %vm1381_vm7 = vcmask 589312   ;;  %vm1388_vm8 = vcmask 654912  }
  0x19   : > { %v2154_v4 = vld [vmem:[%s2148_s0] sm:$0xff]   ;;  %v2170_v9 = vld [vmem:[%s2148_s0 + $0x8] sm:$0xff]   ;;  %v2173_v10 = vld [vmem:[%s2148_s0 + $0x10] sm:$0xff]   ;;  %1626 = vmatpush3.bf16.msra.mxu1 %v1760_v16  ;;  %v387_v26 = vsub.s32 0, %v2222_v25  ;;  %vm1395_vm9 = vcmask 720512   ;;  %s272_s23 = sand.u32 1, %s2028_s30  }
  0x1a   : > { %1609 = vmatprep.mubr.bf16.mxu0 %v2154_v4  ;;  %v2178_v11 = vld [vmem:[%s2148_s0 + $0x18] sm:$0xff]   ;;  %v2181_v12 = vld [vmem:[%s2148_s0 + $0x20] sm:$0xff]   ;;  %v2186_v13 = vld [vmem:[%s2148_s0 + $0x28] sm:$0xff]   ;;  %1627 = vmatprep.subr.bf16.mxu1 %v1761_v17  ;;  %vm1402_vm10 = vcmask 786112   ;;  %vm1409_vm11 = vcmask 851712   ;;  %vm1416_vm12 = vcmask 917312  }
  0x1b   : > { %1596 = vmatpush3.bf16.msra.mxu0 %v1745_v1  ;;  %v2189_v14 = vld [vmem:[%s2148_s0 + $0x30] sm:$0xff]   ;;  %v2194_v15 = vld [vmem:[%s2148_s0 + $0x38] sm:$0xff]   ;;  %v1766_v22 = vld [vmem:[%s2651_s4 + $0x8] sm:$0xff]   ;;  %vm1423_vm13 = vcmask 982912   ;;  %s273_s24 = scalar_lea.vmem [#allocation4], %s272_s23  ;;  %vm1430_vm14 = vcmask 1048512  }
  0x1c   : > { %1597 = vmatprep.subr.bf16.mxu0 %v1746_v2  ;;  %v1764_v20 = vld [vmem:[%s2651_s4 + $0x18] sm:$0xff]   ;;  %v1765_v21 = vld [vmem:[%s2651_s4 + $0x10] sm:$0xff]   ;;  %v1767_v23 = vld [vmem:[%s2651_s4] sm:$0xff]   ;;  %s1447_s25 = sshll.u32 %s273_s24, 4  ;;  %s1435_s11 = scalar_lea.sflag [#allocation5], %s272_s23  ;;  %s1448_s25 = int_to_ptr.vmem [resolvable:$true] %s1447_s25 }
  0x1d   : > { %1628 = vmatpush3.bf16.msra.mxu1 %v1761_v17  ;;  %v2228_v27 = vld [vmem:[%s2654_s7] sm:$0x7]  ;;  %s1976_s13 = scalar_lea.vmem %s1448_s25, 16  ;;  %s1980_s0 = sshll.u32 %s2038_s14, 4  ;;  %s1981_s0 = int_to_ptr.vmem [resolvable:$false] %s1980_s0 }
  0x1e   : > { %1629 = vmatprep.subr.bf16.mxu1 %v1762_v18  ;;  %v2231_v28 = vrot.slane %v2228_v27, %v387_v26  ;;  %p1977_p11 = scmp.ne.s32.totalorder %s1448_s25, %s1976_s13  ;;  %s1982_s18 = scalar_lea.vmem %s1981_s0, 32 }
  0x1f   : > { %1598 = vmatpush3.bf16.msra.mxu0 %v1746_v2  ;;  %p1983_p0 = scmp.lt.s32.totalorder %s1448_s25, %s1981_s0  ;;  %p1984_p1 = scmp.lt.s32.totalorder %s1982_s18, %s1976_s13 }
  0x20   : > { %1599 = vmatprep.subr.bf16.mxu0 %v1747_v3  ;;  %p1978_p12 = pnand %p1977_p11, %p2122_p5 }
  0x21   : > { %1630 = vmatpush3.bf16.msra.mxu1 %v1762_v18  ;;  %p1985_p2 = por %p1984_p1, %p1983_p0 }
  0x22   : > { %1631 = vmatprep.subr.bf16.mxu1 %v1763_v19  ;;  %p1979_p13 = pneg %p1978_p12 }
  0x23   : > { %1600 = vmatpush3.bf16.msra.mxu0 %v1747_v3 }
  0x24   : > { %1601 = vmatprep.subr.bf16.mxu0 %v1748_v5  ;;  %p1986_p3 = pnand %p1985_p2, %p1979_p13 }
  0x25   : > { %1632 = vmatpush3.bf16.msra.mxu1 %v1763_v19 }
  0x26   : > { %1633 = vmatprep.subr.bf16.mxu1 %v1764_v20 }
  0x27   : > { %1602 = vmatpush3.bf16.msra.mxu0 %v1748_v5 }
  0x28   : > { %1603 = vmatprep.subr.bf16.mxu0 %v1749_v6 }
  0x29   : > { %1634 = vmatpush3.bf16.msra.mxu1 %v1764_v20 }
  0x2a   : > { %1635 = vmatprep.subr.bf16.mxu1 %v1765_v21 }
  0x2b   : > { %1604 = vmatpush3.bf16.msra.mxu0 %v1749_v6 }
  0x2c   : > { %1605 = vmatprep.subr.bf16.mxu0 %v1750_v7 }
  0x2d   : > { %1636 = vmatpush3.bf16.msra.mxu1 %v1765_v21 }
  0x2e   : > { %1637 = vmatprep.subr.bf16.mxu1 %v1766_v22 }
  0x2f   : > { %1606 = vmatpush3.bf16.msra.mxu0 %v1750_v7 }
  0x30   : > { %1607 = vmatprep.subr.bf16.mxu0 %v1751_v8 }
  0x31   : > { %1638 = vmatpush3.bf16.msra.mxu1 %v1766_v22 }
  0x32   : > { %1639 = vmatprep.subr.bf16.mxu1 %v1767_v23 }
  0x33   : > { %1608 = vmatpush3.bf16.msra.mxu0 %v1751_v8 }
  0x35   : > { %1640 = vmatpush3.bf16.msra.mxu1 %v1767_v23 }
  0x36   : > { %1610 = vmatmul.mubr.bf16.vlgmr.msra.gmra.mxu0 %v2170_v9 }
  0x37   : > { %1613 = vmatprep.mubr.bf16.mxu0 %v2173_v10 }
  0x3e   : > { %1614 = vmatmul.mubr.bf16.gmra.mxu0 %v2178_v11 }
  0x3f   : > { %1617 = vmatprep.mubr.bf16.mxu0 %v2181_v12 }
  0x46   : > { %1618 = vmatmul.mubr.bf16.gmra.mxu0 %v2186_v13 }
  0x47   : > { %1621 = vmatprep.mubr.bf16.mxu0 %v2189_v14 }
  0x4e   : > { %1622 = vmatmul.mubr.bf16.gmra.mxu0 %v2194_v15 }
  0xf6   : > { %v1611_v29 = vpop.f32.mrf.mxu0 }
  0xf7   : > { %v2234_v30 = vadd.f32 %v1611_v29, %v2231_v28 }
  0xf8   : > { %v519_v31 = vpop.f32.mrf.mxu0 }
  0xf9   : > { %v584_v32 = vsub.f32 0.0, %v2234_v30  ;;  %v2238_v33 = vadd.f32 %v519_v31, %v2231_v28 }
  0xfa   : > { %v1612_v34 = vpop.f32.mrf.mxu0 }
  0xfb   : > { %v602_v35 = vmul.f32 1.442695, %v584_v32  ;;  %v582_v36 = vsub.f32 0.0, %v2238_v33  ;;  %v2242_v37 = vadd.f32 %v1612_v34, %v2231_v28 }
  0xfc   : > { %v522_v38 = vpop.f32.mrf.mxu0 }
  0xfd   : > { %1784 = vpow2.f32 %v602_v35  ;;  %v598_v39 = vmul.f32 1.442695, %v582_v36  ;;  %v585_v40 = vsub.f32 0.0, %v2242_v37  ;;  %v2246_v41 = vadd.f32 %v522_v38, %v2231_v28 }
  0xfe   : > { %v1615_v42 = vpop.f32.mrf.mxu0 }
  0xff   : > { %1786 = vpow2.f32 %v598_v39  ;;  %v604_v43 = vmul.f32 1.442695, %v585_v40  ;;  %v583_v44 = vsub.f32 0.0, %v2246_v41  ;;  %v2250_v45 = vadd.f32 %v1615_v42, %v2231_v28 }
 0x100   : > { %v535_v46 = vpop.f32.mrf.mxu0 }
 0x101   : > { %1788 = vpow2.f32 %v604_v43  ;;  %v600_v47 = vmul.f32 1.442695, %v583_v44  ;;  %v588_v48 = vsub.f32 0.0, %v2250_v45  ;;  %v2254_v49 = vadd.f32 %v535_v46, %v2231_v28 }
 0x102   : > { %v1616_v50 = vpop.f32.mrf.mxu0 }
 0x103   : > { %1790 = vpow2.f32 %v600_v47  ;;  %v610_v51 = vmul.f32 1.442695, %v588_v48  ;;  %v586_v52 = vsub.f32 0.0, %v2254_v49  ;;  %v2258_v53 = vadd.f32 %v1616_v50, %v2231_v28 }
 0x104   : > { %v538_v54 = vpop.f32.mrf.mxu0 }
 0x105   : > { %1792 = vpow2.f32 %v610_v51  ;;  %v606_v55 = vmul.f32 1.442695, %v586_v52  ;;  %v589_v56 = vsub.f32 0.0, %v2258_v53  ;;  %v2262_v57 = vadd.f32 %v538_v54, %v2231_v28 }
 0x106   : > { %v1619_v58 = vpop.f32.mrf.mxu0 }
 0x107   : > { %1794 = vpow2.f32 %v606_v55  ;;  %v612_v59 = vmul.f32 1.442695, %v589_v56  ;;  %v587_v60 = vsub.f32 0.0, %v2262_v57  ;;  %v2266_v61 = vadd.f32 %v1619_v58, %v2231_v28 }
 0x108   : > { %v551_v62 = vpop.f32.mrf.mxu0 }
 0x109   : > { %1796 = vpow2.f32 %v612_v59  ;;  %v608_v63 = vmul.f32 1.442695, %v587_v60  ;;  %v592_v0 = vsub.f32 0.0, %v2266_v61  ;;  %v2270_v1 = vadd.f32 %v551_v62, %v2231_v28 }
 0x10a   : > { %v1785_v2 = vpop.eup %1784  ;;  %v1620_v3 = vpop.f32.mrf.mxu0 }
 0x10b   : > { %v632_v5 = vadd.f32 1.0, %v1785_v2  ;;  %1798 = vpow2.f32 %v608_v63  ;;  %v618_v6 = vmul.f32 1.442695, %v592_v0  ;;  %v590_v7 = vsub.f32 0.0, %v2270_v1 }
 0x10c   : > { %v1787_v8 = vpop.eup %1786  ;;  %v2274_v16 = vadd.f32 %v1620_v3, %v2231_v28  ;;  %v554_v17 = vpop.f32.mrf.mxu0 }
 0x10d   : > { %1800 = vrcp.f32 %v632_v5  ;;  %v630_v18 = vadd.f32 1.0, %v1787_v8  ;;  %v614_v19 = vmul.f32 1.442695, %v590_v7  ;;  %v2277_v20 = vadd.f32 %v554_v17, %v2231_v28 }
 0x10e   : > { %v1789_v21 = vpop.eup %1788  ;;  %1802 = vpow2.f32 %v618_v6  ;;  %v593_v22 = vsub.f32 0.0, %v2274_v16  ;;  %v1623_v23 = vpop.f32.mrf.mxu0 }
 0x10f   : > { %1804 = vrcp.f32 %v630_v18  ;;  %v633_v26 = vadd.f32 1.0, %v1789_v21  ;;  %v591_v29 = vsub.f32 0.0, %v2277_v20  ;;  %v2282_v31 = vadd.f32 %v1623_v23, %v2231_v28 }
 0x110   : > { %v1791_v32 = vpop.eup %1790  ;;  %1806 = vpow2.f32 %v614_v19  ;;  %v620_v34 = vmul.f32 1.442695, %v593_v22  ;;  %v567_v35 = vpop.f32.mrf.mxu0 }
 0x111   : > { %1808 = vrcp.f32 %v633_v26  ;;  %v631_v36 = vadd.f32 1.0, %v1791_v32  ;;  %v616_v38 = vmul.f32 1.442695, %v591_v29  ;;  %v596_v39 = vsub.f32 0.0, %v2282_v31 }
 0x112   : > { %v1793_v40 = vpop.eup %1792  ;;  %1810 = vpow2.f32 %v620_v34  ;;  %v2286_v42 = vadd.f32 %v567_v35, %v2231_v28  ;;  %v1624_v43 = vpop.f32.mrf.mxu0 }
 0x113   : > { %1812 = vrcp.f32 %v631_v36  ;;  %v636_v44 = vadd.f32 1.0, %v1793_v40  ;;  %v626_v46 = vmul.f32 1.442695, %v596_v39  ;;  %v2289_v47 = vadd.f32 %v1624_v43, %v2231_v28 }
 0x114   : > { %v1795_v48 = vpop.eup %1794  ;;  %1814 = vpow2.f32 %v616_v38  ;;  %v594_v50 = vsub.f32 0.0, %v2286_v42  ;;  %v570_v51 = vpop.f32.mrf.mxu0 }
 0x115   : > { %1816 = vrcp.f32 %v636_v44  ;;  %v634_v52 = vadd.f32 1.0, %v1795_v48  ;;  %v597_v54 = vsub.f32 0.0, %v2289_v47  ;;  %v2294_v55 = vadd.f32 %v570_v51, %v2231_v28 }
 0x116   : > { %v1797_v56 = vpop.eup %1796  ;;  %1818 = vpow2.f32 %v626_v46  ;;  %v622_v58 = vmul.f32 1.442695, %v594_v50 }
 0x117   : > { %1820 = vrcp.f32 %v634_v52  ;;  %v637_v59 = vadd.f32 1.0, %v1797_v56  ;;  %v628_v60 = vmul.f32 1.442695, %v597_v54  ;;  %v595_v62 = vsub.f32 0.0, %v2294_v55 }
 0x118   : > { %v1799_v63 = vpop.eup %1798  ;;  %1822 = vpow2.f32 %v622_v58 }
 0x119   : > { %1824 = vrcp.f32 %v637_v59  ;;  %v635_v0 = vadd.f32 1.0, %v1799_v63  ;;  %v624_v2 = vmul.f32 1.442695, %v595_v62 }
 0x11a   : > { %v1801_v3 = vpop.eup %1800  ;;  %1826 = vpow2.f32 %v628_v60 }
 0x11b   : > { %v1803_v5 = vpop.eup %1802  ;;  %1828 = vrcp.f32 %v635_v0  ;;  %v664_v34 = vmul.f32 %v1801_v3, %v2234_v30 }
 0x11c   : > { %v1805_v6 = vpop.eup %1804  ;;  %1830 = vpow2.f32 %v624_v2  ;;  %v640_v18 = vadd.f32 1.0, %v1803_v5 }
 0x11d   : > { %v1807_v28 = vpop.eup %1806  ;;  %v662_v26 = vmul.f32 %v1805_v6, %v2238_v33 }
 0x11e   : > { %v1809_v7 = vpop.eup %1808  ;;  %v638_v8 = vadd.f32 1.0, %v1807_v28 }
 0x11f   : > { %v1811_v17 = vpop.eup %1810  ;;  %v665_v21 = vmul.f32 %v1809_v7, %v2242_v37 }
 0x120   : > { %v1813_v19 = vpop.eup %1812  ;;  %v641_v22 = vadd.f32 1.0, %v1811_v17  ;;  %1832 = vrcp.f32 %v638_v8 }
 0x121   : > { %v1815_v23 = vpop.eup %1814  ;;  %v663_v29 = vmul.f32 %v1813_v19, %v2246_v41  ;;  %v679_v40 = vpack.c.bf16 %v665_v21, %v664_v34  ;;  %v1773_v19 = vld [vmem:[%s2652_s5 + $0x10] sm:$0xff]   ;;  %v1774_v21 = vld [vmem:[%s2652_s5 + $0x8] sm:$0xff]  }
 0x122   : > { %v1817_v32 = vpop.eup %1816  ;;  %1834 = vrcp.f32 %v641_v22  ;;  %v639_v35 = vadd.f32 1.0, %v1815_v23  ;;  %v1775_v22 = vld [vmem:[%s2652_s5] sm:$0xff]   ;;  %v704_v23 = vsub.s32 1, %v2222_v25 }
 0x123   : > { %v1819_v36 = vpop.eup %1818  ;;  %1836 = vrcp.f32 %v640_v18  ;;  %v678_v38 = vpack.c.bf16 %v663_v29, %v662_v26  ;;  %v668_v54 = vmul.f32 %v1817_v32, %v2250_v45 }
 0x124   : > { %v1821_v39 = vpop.eup %1820  ;;  %1838 = vrcp.f32 %v639_v35  ;;  %v644_v33 = vadd.f32 1.0, %v1819_v36  ;;  %v2339_v26 = vrot.slane %v2228_v27, %v704_v23 }
 0x125   : > { %v1823_v43 = vpop.eup %1822  ;;  %1641 = vmatprep.mubr.bf16.mxu1 %v678_v38  ;;  %v666_v51 = vmul.f32 %v1821_v39, %v2254_v49 }
 0x126   : > { %v1825_v37 = vpop.eup %1824  ;;  %v642_v44 = vadd.f32 1.0, %v1823_v43  ;;  %1642 = vmatmul.mubr.bf16.vlgmr.msra.gmra.mxu1 %v679_v40 }
 0x127   : > { %v1827_v46 = vpop.eup %1826  ;;  %v669_v41 = vmul.f32 %v1825_v37, %v2258_v53 }
 0x128   : > { %v1829_v48 = vpop.eup %1828  ;;  %v645_v50 = vadd.f32 1.0, %v1827_v46  ;;  %1840 = vrcp.f32 %v642_v44 }
 0x129   : > { %v1831_v30 = vpop.eup %1830  ;;  %v667_v52 = vmul.f32 %v1829_v48, %v2262_v57  ;;  %v681_v59 = vpack.c.bf16 %v669_v41, %v668_v54 }
 0x12a   : > { %1842 = vrcp.f32 %v645_v50  ;;  %v643_v56 = vadd.f32 1.0, %v1831_v30 }
 0x12b   : > { %1844 = vrcp.f32 %v644_v33  ;;  %v680_v58 = vpack.c.bf16 %v667_v52, %v666_v51 }
 0x12c   : > { %1846 = vrcp.f32 %v643_v56 }
 0x12d   : > { %1645 = vmatprep.mubr.bf16.mxu1 %v680_v58  ;;  %v1833_v60 = vpop.eup %1832 }
 0x12e   : > { %1646 = vmatmul.mubr.bf16.gmra.mxu1 %v681_v59  ;;  %v670_v49 = vmul.f32 %v1833_v60, %v2270_v1 }
 0x12f   : > { %v1835_v62 = vpop.eup %1834 }
 0x130   : > { %v1837_v53 = vpop.eup %1836  ;;  %v673_v0 = vmul.f32 %v1835_v62, %v2274_v16 }
 0x131   : > { %v1839_v63 = vpop.eup %1838  ;;  %v672_v45 = vmul.f32 %v1837_v53, %v2266_v61  ;;  %v1768_v61 = vld [vmem:[%s2652_s5 + $0x38] sm:$0xff]  }
 0x132   : > { %v671_v57 = vmul.f32 %v1839_v63, %v2277_v20  ;;  %1657 = vmatprep.subr.bf16.mxu0 %v1768_v61  ;;  %1689 = vmatprep.subr.bf16.mxu1 %v1768_v61 }
 0x133   : > { %v683_v3 = vpack.c.bf16 %v673_v0, %v672_v45  ;;  %1658 = vmatpush3.bf16.msra.mxu0 %v1768_v61  ;;  %1697 = vmatpush3.bf16.msra.mxu1 %v1768_v61 }
 0x134   : > { %v682_v2 = vpack.c.bf16 %v671_v57, %v670_v49 }
 0x135   : > { %v1841_v5 = vpop.eup %1840 }
 0x136   : > { %1649 = vmatprep.mubr.bf16.mxu1 %v682_v2  ;;  %v674_v17 = vmul.f32 %v1841_v5, %v2286_v42  ;;  %v1769_v42 = vld [vmem:[%s2652_s5 + $0x30] sm:$0xff]  }
 0x137   : > { %v1843_v6 = vpop.eup %1842  ;;  %1650 = vmatmul.mubr.bf16.gmra.mxu1 %v683_v3  ;;  %1659 = vmatprep.subr.bf16.mxu0 %v1769_v42 }
 0x138   : > { %v1845_v28 = vpop.eup %1844  ;;  %v677_v8 = vmul.f32 %v1843_v6, %v2289_v47  ;;  %1690 = vmatprep.subr.bf16.mxu1 %v1769_v42  ;;  %1660 = vmatpush3.bf16.msra.mxu0 %v1769_v42  ;;  %v1771_v47 = vld [vmem:[%s2652_s5 + $0x20] sm:$0xff]  }
 0x139   : > { %v1847_v7 = vpop.eup %1846  ;;  %v676_v1 = vmul.f32 %v1845_v28, %v2282_v31  ;;  %1698 = vmatpush3.bf16.msra.mxu1 %v1769_v42  ;;  %v1770_v31 = vld [vmem:[%s2652_s5 + $0x28] sm:$0xff]  }
 0x13a   : > { %v675_v16 = vmul.f32 %v1847_v7, %v2294_v55  ;;  %1661 = vmatprep.subr.bf16.mxu0 %v1770_v31  ;;  %1691 = vmatprep.subr.bf16.mxu1 %v1770_v31  ;;  %v1772_v55 = vld [vmem:[%s2652_s5 + $0x18] sm:$0xff]  }
 0x13b   : > { %v685_v20 = vpack.c.bf16 %v677_v8, %v676_v1 }
 0x13c   : > { %v684_v18 = vpack.c.bf16 %v675_v16, %v674_v17  ;;  %1662 = vmatpush3.bf16.msra.mxu0 %v1770_v31 }
 0x13d   : > { %1699 = vmatpush3.bf16.msra.mxu1 %v1770_v31  ;;  %1663 = vmatprep.subr.bf16.mxu0 %v1771_v47 }
 0x13e   : > { %1653 = vmatprep.mubr.bf16.mxu1 %v684_v18  ;;  %1692 = vmatprep.subr.bf16.mxu1 %v1771_v47 }
 0x13f   : > { %1654 = vmatmul.mubr.bf16.gmra.mxu1 %v685_v20 }
 0x140   : > { %1664 = vmatpush3.bf16.msra.mxu0 %v1771_v47 }
 0x141   : > { %1700 = vmatpush3.bf16.msra.mxu1 %v1771_v47  ;;  %1665 = vmatprep.subr.bf16.mxu0 %v1772_v55 }
 0x142   : > { %1693 = vmatprep.subr.bf16.mxu1 %v1772_v55 }
 0x144   : > { %1666 = vmatpush3.bf16.msra.mxu0 %v1772_v55 }
 0x145   : > { %1701 = vmatpush3.bf16.msra.mxu1 %v1772_v55  ;;  %1667 = vmatprep.subr.bf16.mxu0 %v1773_v19 }
 0x146   : > { %1694 = vmatprep.subr.bf16.mxu1 %v1773_v19 }
 0x148   : > { %1668 = vmatpush3.bf16.msra.mxu0 %v1773_v19 }
 0x149   : > { %1702 = vmatpush3.bf16.msra.mxu1 %v1773_v19  ;;  %1669 = vmatprep.subr.bf16.mxu0 %v1774_v21 }
 0x14a   : > { %1695 = vmatprep.subr.bf16.mxu1 %v1774_v21 }
 0x14c   : > { %1670 = vmatpush3.bf16.msra.mxu0 %v1774_v21 }
 0x14d   : > { %1703 = vmatpush3.bf16.msra.mxu1 %v1774_v21  ;;  %1671 = vmatprep.subr.bf16.mxu0 %v1775_v22 }
 0x14e   : > { %1696 = vmatprep.subr.bf16.mxu1 %v1775_v22 }
 0x150   : > { %1672 = vmatpush3.bf16.msra.mxu0 %v1775_v22 }
 0x151   : > { %1704 = vmatpush3.bf16.msra.mxu1 %v1775_v22 }
 0x1e6   : > { %v1643_v29 = vpop.f32.mrf.mxu1 }
 0x1e7   : > { %v2342_v32 = vadd.f32 %v1643_v29, %v2339_v26 }
 0x1e8   : > { %v788_v34 = vpop.f32.mrf.mxu1 }
 0x1e9   : > { %v853_v35 = vsub.f32 0.0, %v2342_v32  ;;  %v2346_v36 = vadd.f32 %v788_v34, %v2339_v26 }
 0x1ea   : > { %v1644_v38 = vpop.f32.mrf.mxu1 }
 0x1eb   : > { %v871_v39 = vmul.f32 1.442695, %v853_v35  ;;  %v851_v40 = vsub.f32 0.0, %v2346_v36  ;;  %v2350_v43 = vadd.f32 %v1644_v38, %v2339_v26 }
 0x1ec   : > { %v791_v37 = vpop.f32.mrf.mxu1 }
 0x1ed   : > { %1848 = vpow2.f32 %v871_v39  ;;  %v867_v44 = vmul.f32 1.442695, %v851_v40  ;;  %v854_v46 = vsub.f32 0.0, %v2350_v43  ;;  %v2354_v33 = vadd.f32 %v791_v37, %v2339_v26 }
 0x1ee   : > { %v1647_v48 = vpop.f32.mrf.mxu1 }
 0x1ef   : > { %1850 = vpow2.f32 %v867_v44  ;;  %v873_v41 = vmul.f32 1.442695, %v854_v46  ;;  %v852_v50 = vsub.f32 0.0, %v2354_v33  ;;  %v2358_v30 = vadd.f32 %v1647_v48, %v2339_v26 }
 0x1f0   : > { %v804_v51 = vpop.f32.mrf.mxu1 }
 0x1f1   : > { %1852 = vpow2.f32 %v873_v41  ;;  %v869_v52 = vmul.f32 1.442695, %v852_v50  ;;  %v857_v54 = vsub.f32 0.0, %v2358_v30  ;;  %v2362_v56 = vadd.f32 %v804_v51, %v2339_v26 }
 0x1f2   : > { %v1648_v58 = vpop.f32.mrf.mxu1 }
 0x1f3   : > { %1854 = vpow2.f32 %v869_v52  ;;  %v879_v59 = vmul.f32 1.442695, %v857_v54  ;;  %v855_v60 = vsub.f32 0.0, %v2362_v56  ;;  %v2366_v62 = vadd.f32 %v1648_v58, %v2339_v26 }
 0x1f4   : > { %v807_v53 = vpop.f32.mrf.mxu1 }
 0x1f5   : > { %1856 = vpow2.f32 %v879_v59  ;;  %v875_v63 = vmul.f32 1.442695, %v855_v60  ;;  %v858_v0 = vsub.f32 0.0, %v2366_v62  ;;  %v2370_v49 = vadd.f32 %v807_v53, %v2339_v26 }
 0x1f7   : > { %1858 = vpow2.f32 %v875_v63  ;;  %v881_v57 = vmul.f32 1.442695, %v858_v0  ;;  %v856_v45 = vsub.f32 0.0, %v2370_v49  ;;  %v1651_v2 = vpop.f32.mrf.mxu1 }
 0x1f8   : > { %v2374_v3 = vadd.f32 %v1651_v2, %v2339_v26 }
 0x1f9   : > { %1860 = vpow2.f32 %v881_v57  ;;  %v877_v5 = vmul.f32 1.442695, %v856_v45  ;;  %v820_v6 = vpop.f32.mrf.mxu1 }
 0x1fa   : > { %v1849_v28 = vpop.eup %1848  ;;  %v861_v7 = vsub.f32 0.0, %v2374_v3  ;;  %v2378_v8 = vadd.f32 %v820_v6, %v2339_v26 }
 0x1fb   : > { %v901_v17 = vadd.f32 1.0, %v1849_v28  ;;  %1862 = vpow2.f32 %v877_v5  ;;  %v1652_v16 = vpop.f32.mrf.mxu1 }
 0x1fc   : > { %v1851_v1 = vpop.eup %1850  ;;  %v887_v18 = vmul.f32 1.442695, %v861_v7  ;;  %v859_v20 = vsub.f32 0.0, %v2378_v8  ;;  %v2382_v61 = vadd.f32 %v1652_v16, %v2339_v26 }
 0x1fd   : > { %1864 = vrcp.f32 %v901_v17  ;;  %v899_v42 = vadd.f32 1.0, %v1851_v1  ;;  %v823_v31 = vpop.f32.mrf.mxu1 }
 0x1fe   : > { %v1853_v47 = vpop.eup %1852  ;;  %1866 = vpow2.f32 %v887_v18  ;;  %v883_v55 = vmul.f32 1.442695, %v859_v20  ;;  %v862_v19 = vsub.f32 0.0, %v2382_v61  ;;  %v2386_v21 = vadd.f32 %v823_v31, %v2339_v26 }
 0x1ff   : > { %1868 = vrcp.f32 %v899_v42  ;;  %v902_v22 = vadd.f32 1.0, %v1853_v47  ;;  %v1655_v23 = vpop.f32.mrf.mxu1 }
 0x200   : > { %v1855_v29 = vpop.eup %1854  ;;  %1870 = vpow2.f32 %v883_v55  ;;  %v889_v34 = vmul.f32 1.442695, %v862_v19  ;;  %v860_v35 = vsub.f32 0.0, %v2386_v21  ;;  %v2390_v38 = vadd.f32 %v1655_v23, %v2339_v26 }
 0x201   : > { %1872 = vrcp.f32 %v902_v22  ;;  %v900_v39 = vadd.f32 1.0, %v1855_v29  ;;  %v836_v40 = vpop.f32.mrf.mxu1 }
 0x202   : > { %v1857_v37 = vpop.eup %1856  ;;  %1874 = vpow2.f32 %v889_v34  ;;  %v885_v44 = vmul.f32 1.442695, %v860_v35  ;;  %v865_v46 = vsub.f32 0.0, %v2390_v38  ;;  %v2394_v48 = vadd.f32 %v836_v40, %v2339_v26 }
 0x203   : > { %1876 = vrcp.f32 %v900_v39  ;;  %v905_v41 = vadd.f32 1.0, %v1857_v37  ;;  %v1656_v50 = vpop.f32.mrf.mxu1 }
 0x204   : > { %v1859_v51 = vpop.eup %1858  ;;  %1878 = vpow2.f32 %v885_v44  ;;  %v895_v52 = vmul.f32 1.442695, %v865_v46  ;;  %v863_v54 = vsub.f32 0.0, %v2394_v48  ;;  %v2398_v58 = vadd.f32 %v1656_v50, %v2339_v26 }
 0x205   : > { %1880 = vrcp.f32 %v905_v41  ;;  %v903_v59 = vadd.f32 1.0, %v1859_v51  ;;  %v839_v60 = vpop.f32.mrf.mxu1 }
 0x206   : > { %v1861_v53 = vpop.eup %1860  ;;  %1882 = vpow2.f32 %v895_v52  ;;  %v891_v63 = vmul.f32 1.442695, %v863_v54  ;;  %v866_v0 = vsub.f32 0.0, %v2398_v58  ;;  %v2402_v57 = vadd.f32 %v839_v60, %v2339_v26 }
 0x207   : > { %1884 = vrcp.f32 %v903_v59  ;;  %v906_v45 = vadd.f32 1.0, %v1861_v53 }
 0x208   : > { %v1863_v2 = vpop.eup %1862  ;;  %1886 = vpow2.f32 %v891_v63  ;;  %v897_v5 = vmul.f32 1.442695, %v866_v0  ;;  %v864_v6 = vsub.f32 0.0, %v2402_v57 }
 0x209   : > { %1888 = vrcp.f32 %v906_v45  ;;  %v904_v28 = vadd.f32 1.0, %v1863_v2 }
 0x20a   : > { %v1865_v7 = vpop.eup %1864  ;;  %1890 = vpow2.f32 %v897_v5  ;;  %v893_v17 = vmul.f32 1.442695, %v864_v6 }
 0x20b   : > { %v1867_v16 = vpop.eup %1866  ;;  %1892 = vrcp.f32 %v904_v28  ;;  %v933_v35 = vmul.f32 %v1865_v7, %v2342_v32 }
 0x20c   : > { %v1869_v1 = vpop.eup %1868  ;;  %1894 = vpow2.f32 %v893_v17  ;;  %v909_v31 = vadd.f32 1.0, %v1867_v16 }
 0x20d   : > { %v1871_v18 = vpop.eup %1870  ;;  %v931_v23 = vmul.f32 %v1869_v1, %v2346_v36 }
 0x20e   : > { %v1873_v20 = vpop.eup %1872  ;;  %v907_v26 = vadd.f32 1.0, %v1871_v18 }
 0x20f   : > { %v1875_v42 = vpop.eup %1874  ;;  %v934_v55 = vmul.f32 %v1873_v20, %v2350_v43 }
 0x210   : > { %v1877_v47 = vpop.eup %1876  ;;  %v910_v19 = vadd.f32 1.0, %v1875_v42  ;;  %1896 = vrcp.f32 %v907_v26 }
 0x211   : > { %v1879_v22 = vpop.eup %1878  ;;  %v932_v29 = vmul.f32 %v1877_v47, %v2354_v33  ;;  %v948_v46 = vpack.c.bf16 %v934_v55, %v933_v35  ;;  %v1508_v47 = vld [vmem:[%s2649_s2] ss:$0 sm:$0xff]  ;;  %v298_v55 = vunpack.c.h.bf16 %v2154_v4 }
 0x212   : > { %v1881_v34 = vpop.eup %1880  ;;  %1898 = vrcp.f32 %v910_v19  ;;  %v908_v39 = vadd.f32 1.0, %v1879_v22 }
 0x213   : > { %v1883_v40 = vpop.eup %1882  ;;  %1900 = vrcp.f32 %v909_v31  ;;  %v947_v37 = vpack.c.bf16 %v932_v29, %v931_v23  ;;  %v937_v53 = vmul.f32 %v1881_v34, %v2358_v30  ;;  %v301_v23 = vunpack.c.l.bf16 %v2173_v10 }
 0x214   : > { %v1885_v44 = vpop.eup %1884  ;;  %1902 = vrcp.f32 %v908_v39  ;;  %v913_v51 = vadd.f32 1.0, %v1883_v40  ;;  %v302_v34 = vunpack.c.h.bf16 %v2173_v10  ;;  %v304_v40 = vunpack.c.h.bf16 %v2178_v11 }
 0x215   : > { %v1887_v41 = vpop.eup %1886  ;;  %1673 = vmatprep.mubr.bf16.mxu0 %v947_v37  ;;  %v935_v59 = vmul.f32 %v1885_v44, %v2362_v56  ;;  %v324_v29 = vmul.f32 %v1508_v47, %v301_v23  ;;  %v307_v10 = vunpack.c.l.bf16 %v2186_v13 }
 0x216   : > { %v1889_v43 = vpop.eup %1888  ;;  %v911_v50 = vadd.f32 1.0, %v1887_v41  ;;  %1674 = vmatmul.mubr.bf16.vlgmr.msra.gmra.mxu0 %v948_v46  ;;  %v325_v35 = vmul.f32 %v1508_v47, %v302_v34  ;;  %v327_v37 = vmul.f32 %v1508_v47, %v304_v40  ;;  %v306_v46 = vunpack.c.h.bf16 %v2181_v12 }
 0x217   : > { %v1891_v36 = vpop.eup %1890  ;;  %v938_v52 = vmul.f32 %v1889_v43, %v2366_v62  ;;  %v330_v43 = vmul.f32 %v1508_v47, %v307_v10 }
 0x218   : > { %v1893_v33 = vpop.eup %1892  ;;  %v914_v54 = vadd.f32 1.0, %v1891_v36  ;;  %1904 = vrcp.f32 %v911_v50  ;;  %v329_v41 = vmul.f32 %v1508_v47, %v306_v46  ;;  %v308_v50 = vunpack.c.h.bf16 %v2186_v13 }
 0x219   : > { %v1895_v32 = vpop.eup %1894  ;;  %v936_v60 = vmul.f32 %v1893_v33, %v2370_v49  ;;  %v950_v45 = vpack.c.bf16 %v938_v52, %v937_v53  ;;  %v310_v33 = vunpack.c.h.bf16 %v2189_v14  ;;  %v973_v13 = vsub.s32 2, %v2222_v25 }
 0x21a   : > { %1906 = vrcp.f32 %v914_v54  ;;  %v912_v63 = vadd.f32 1.0, %v1895_v32  ;;  %v331_v36 = vmul.f32 %v1508_v47, %v308_v50  ;;  %v312_v32 = vunpack.c.h.bf16 %v2194_v15 }
 0x21b   : > { %1908 = vrcp.f32 %v913_v51  ;;  %v949_v0 = vpack.c.bf16 %v936_v60, %v935_v59  ;;  %v333_v52 = vmul.f32 %v1508_v47, %v310_v33  ;;  %v2442_v60 = vrot.slane %v2228_v27, %v973_v13 }
 0x21c   : > { %1910 = vrcp.f32 %v912_v63  ;;  %v335_v59 = vmul.f32 %v1508_v47, %v312_v32 }
 0x21d   : > { %1677 = vmatprep.mubr.bf16.mxu0 %v949_v0  ;;  %v1897_v2 = vpop.eup %1896 }
 0x21e   : > { %1678 = vmatmul.mubr.bf16.gmra.mxu0 %v950_v45  ;;  %v939_v56 = vmul.f32 %v1897_v2, %v2378_v8 }
 0x21f   : > { %v1899_v5 = vpop.eup %1898 }
 0x220   : > { %v1901_v62 = vpop.eup %1900  ;;  %v942_v28 = vmul.f32 %v1899_v5, %v2382_v61 }
 0x221   : > { %v1903_v6 = vpop.eup %1902  ;;  %v941_v30 = vmul.f32 %v1901_v62, %v2374_v3  ;;  %v297_v3 = vunpack.c.l.bf16 %v2154_v4  ;;  %v303_v4 = vunpack.c.l.bf16 %v2178_v11  ;;  %v309_v11 = vunpack.c.l.bf16 %v2189_v14 }
 0x222   : > { %v940_v49 = vmul.f32 %v1903_v6, %v2386_v21 }
 0x223   : > { %v952_v17 = vpack.c.bf16 %v942_v28, %v941_v30  ;;  %v320_v19 = vmul.f32 %v1508_v47, %v297_v3  ;;  %v326_v39 = vmul.f32 %v1508_v47, %v303_v4  ;;  %v332_v51 = vmul.f32 %v1508_v47, %v309_v11 }
 0x224   : > { %v951_v7 = vpack.c.bf16 %v940_v49, %v939_v56 }
 0x225   : > { %v1905_v16 = vpop.eup %1904  ;;  %336 = vadd.xlane.f32.xlu0 %v320_v19 }
 0x226   : > { %1681 = vmatprep.mubr.bf16.mxu1 %v951_v7  ;;  %v943_v42 = vmul.f32 %v1905_v16, %v2394_v48  ;;  %v299_v48 = vunpack.c.l.bf16 %v2170_v9 }
 0x227   : > { %v1907_v1 = vpop.eup %1906  ;;  %1682 = vmatmul.mubr.bf16.vlgmr.msra.gmra.mxu1 %v952_v17 }
 0x228   : > { %v1909_v18 = vpop.eup %1908  ;;  %v946_v26 = vmul.f32 %v1907_v1, %v2398_v58  ;;  %v321_v58 = vmul.f32 %v1508_v47, %v298_v55 }
 0x229   : > { %v1911_v20 = vpop.eup %1910  ;;  %v945_v8 = vmul.f32 %v1909_v18, %v2390_v38  ;;  %v300_v38 = vunpack.c.h.bf16 %v2170_v9  ;;  %v305_v9 = vunpack.c.l.bf16 %v2181_v12  ;;  %v311_v12 = vunpack.c.l.bf16 %v2194_v15 }
 0x22a   : > { %v944_v61 = vmul.f32 %v1911_v20, %v2402_v57  ;;  %338 = vadd.xlane.f32.xlu0 %v321_v58  ;;  %v322_v57 = vmul.f32 %v1508_v47, %v299_v48 }
 0x22b   : > { %v954_v21 = vpack.c.bf16 %v946_v26, %v945_v8  ;;  %v323_v22 = vmul.f32 %v1508_v47, %v300_v38  ;;  %v328_v44 = vmul.f32 %v1508_v47, %v305_v9  ;;  %v334_v54 = vmul.f32 %v1508_v47, %v311_v12 }
 0x22c   : > { %v953_v31 = vpack.c.bf16 %v944_v61, %v943_v42 }
 0x22e   : > { %1685 = vmatprep.mubr.bf16.mxu1 %v953_v31  ;;  %340 = vadd.xlane.f32.xlu0 %v322_v57 }
 0x22f   : > { %1686 = vmatmul.mubr.bf16.gmra.mxu1 %v954_v21 }
 0x232   : > { %342 = vadd.xlane.f32.xlu0 %v323_v22 }
 0x236   : > { %344 = vadd.xlane.f32.xlu0 %v324_v29 }
 0x23a   : > { %346 = vadd.xlane.f32.xlu0 %v325_v35 }
 0x23e   : > { %348 = vadd.xlane.f32.xlu0 %v326_v39 }
 0x242   : > { %350 = vadd.xlane.f32.xlu0 %v327_v37 }
 0x246   : > { %352 = vadd.xlane.f32.xlu0 %v328_v44 }
 0x24a   : > { %354 = vadd.xlane.f32.xlu0 %v329_v41 }
 0x24e   : > { %356 = vadd.xlane.f32.xlu0 %v330_v43 }
 0x252   : > { %358 = vadd.xlane.f32.xlu0 %v331_v36 }
 0x256   : > { %360 = vadd.xlane.f32.xlu0 %v332_v51 }
 0x25a   : > { %362 = vadd.xlane.f32.xlu0 %v333_v52 }
 0x25e   : > { %364 = vadd.xlane.f32.xlu0 %v334_v54 }
 0x262   : > { %366 = vadd.xlane.f32.xlu0 %v335_v59 }
 0x2d6   : > { %v1675_v53 = vpop.f32.mrf.mxu0 }
 0x2d7   : > { %v2445_v63 = vadd.f32 %v1675_v53, %v2442_v60 }
 0x2d8   : > { %v1057_v14 = vpop.f32.mrf.mxu0 }
 0x2d9   : > { %v1122_v0 = vsub.f32 0.0, %v2445_v63  ;;  %v2449_v45 = vadd.f32 %v1057_v14, %v2442_v60 }
 0x2da   : > { %v1676_v2 = vpop.f32.mrf.mxu0 }
 0x2db   : > { %v1140_v5 = vmul.f32 1.442695, %v1122_v0  ;;  %v1120_v15 = vsub.f32 0.0, %v2449_v45  ;;  %v2453_v62 = vadd.f32 %v1676_v2, %v2442_v60 }
 0x2dc   : > { %v1060_v6 = vpop.f32.mrf.mxu0 }
 0x2dd   : > { %1912 = vpow2.f32 %v1140_v5  ;;  %v1136_v27 = vmul.f32 1.442695, %v1120_v15  ;;  %v1123_v28 = vsub.f32 0.0, %v2453_v62  ;;  %v2457_v56 = vadd.f32 %v1060_v6, %v2442_v60  ;;  %v2498_v5 = vld [vmem:[%s2653_s6] ss:$0 sm:$0xff] }
 0x2de   : > { %v1679_v49 = vpop.f32.mrf.mxu0 }
 0x2df   : > { %1914 = vpow2.f32 %v1136_v27  ;;  %v1142_v30 = vmul.f32 1.442695, %v1123_v28  ;;  %v1121_v7 = vsub.f32 0.0, %v2457_v56  ;;  %v2461_v17 = vadd.f32 %v1679_v49, %v2442_v60 }
 0x2e0   : > { %v1073_v16 = vpop.f32.mrf.mxu0 }
 0x2e1   : > { %1916 = vpow2.f32 %v1142_v30  ;;  %v1138_v1 = vmul.f32 1.442695, %v1121_v7  ;;  %v1126_v18 = vsub.f32 0.0, %v2461_v17  ;;  %v2465_v20 = vadd.f32 %v1073_v16, %v2442_v60 }
 0x2e2   : > { %v1680_v26 = vpop.f32.mrf.mxu0 }
 0x2e3   : > { %1918 = vpow2.f32 %v1138_v1  ;;  %v1148_v42 = vmul.f32 1.442695, %v1126_v18  ;;  %v1124_v61 = vsub.f32 0.0, %v2465_v20  ;;  %v2469_v8 = vadd.f32 %v1680_v26, %v2442_v60 }
 0x2e4   : > { %v1076_v31 = vpop.f32.mrf.mxu0 }
 0x2e5   : > { %1920 = vpow2.f32 %v1148_v42  ;;  %v1144_v21 = vmul.f32 1.442695, %v1124_v61  ;;  %v1127_v3 = vsub.f32 0.0, %v2469_v8  ;;  %v2473_v47 = vadd.f32 %v1076_v31, %v2442_v60 }
 0x2e7   : > { %v1683_v55 = vpop.f32.mrf.mxu1  ;;  %v1150_v19 = vmul.f32 1.442695, %v1127_v3  ;;  %v1125_v58 = vsub.f32 0.0, %v2473_v47  ;;  %1922 = vpow2.f32 %v1144_v21 }
 0x2e8   : > { %v2477_v48 = vadd.f32 %v1683_v55, %v2442_v60 }
 0x2e9   : > { %v1089_v57 = vpop.f32.mrf.mxu1  ;;  %1924 = vpow2.f32 %v1150_v19  ;;  %v1146_v34 = vmul.f32 1.442695, %v1125_v58 }
 0x2ea   : > { %v1913_v38 = vpop.eup %1912  ;;  %v1130_v35 = vsub.f32 0.0, %v2477_v48  ;;  %v2481_v4 = vadd.f32 %v1089_v57, %v2442_v60 }
 0x2eb   : > { %v1170_v22 = vadd.f32 1.0, %v1913_v38  ;;  %v1684_v23 = vpop.f32.mrf.mxu1 }
 0x2ec   : > { %v1915_v29 = vpop.eup %1914  ;;  %v1156_v46 = vmul.f32 1.442695, %v1130_v35  ;;  %v1128_v41 = vsub.f32 0.0, %v2481_v4  ;;  %v2485_v10 = vadd.f32 %v1684_v23, %v2442_v60 }
 0x2ed   : > { %1926 = vrcp.f32 %v1170_v22  ;;  %v1168_v39 = vadd.f32 1.0, %v1915_v29  ;;  %v1092_v40 = vpop.f32.mrf.mxu1 }
 0x2ee   : > { %v1917_v37 = vpop.eup %1916  ;;  %v1152_v11 = vmul.f32 1.442695, %v1128_v41  ;;  %v1131_v51 = vsub.f32 0.0, %v2485_v10  ;;  %v2489_v33 = vadd.f32 %v1092_v40, %v2442_v60 }
 0x2ef   : > { %1928 = vrcp.f32 %v1168_v39  ;;  %v1171_v9 = vadd.f32 1.0, %v1917_v37  ;;  %v1687_v50 = vpop.f32.mrf.mxu1 }
 0x2f0   : > { %v1919_v44 = vpop.eup %1918  ;;  %1930 = vpow2.f32 %v1146_v34  ;;  %v1158_v32 = vmul.f32 1.442695, %v1131_v51  ;;  %v1129_v59 = vsub.f32 0.0, %v2489_v33  ;;  %v2493_v13 = vadd.f32 %v1687_v50, %v2442_v60 }
 0x2f1   : > { %1932 = vrcp.f32 %v1171_v9  ;;  %v1169_v43 = vadd.f32 1.0, %v1919_v44  ;;  %v1105_v12 = vpop.f32.mrf.mxu1 }
 0x2f2   : > { %v1921_v36 = vpop.eup %1920  ;;  %1934 = vpow2.f32 %v1156_v46  ;;  %v1154_v27 = vmul.f32 1.442695, %v1129_v59  ;;  %v1134_v28 = vsub.f32 0.0, %v2493_v13  ;;  %v2503_v49 = vadd.f32 %v1105_v12, %v2442_v60 }
 0x2f3   : > { %1936 = vrcp.f32 %v1169_v43  ;;  %v1174_v52 = vadd.f32 1.0, %v1921_v36  ;;  %v1688_v0 = vpop.f32.mrf.mxu1 }
 0x2f4   : > { %v1923_v54 = vpop.eup %1922  ;;  %1938 = vpow2.f32 %v1152_v11  ;;  %v1132_v42 = vsub.f32 0.0, %v2503_v49  ;;  %v2514_v58 = vadd.f32 %v1688_v0, %v2442_v60 }
 0x2f5   : > { %1940 = vrcp.f32 %v1174_v52  ;;  %v1172_v14 = vadd.f32 1.0, %v1923_v54  ;;  %v1108_v1 = vpop.f32.mrf.mxu1 }
 0x2f6   : > { %v1925_v53 = vpop.eup %1924  ;;  %1942 = vpow2.f32 %v1158_v32  ;;  %v2509_v61 = vadd.f32 %v1108_v1, %v2442_v60  ;;  %v1160_v19 = vmul.f32 1.442695, %v1132_v42  ;;  %v1135_v34 = vsub.f32 0.0, %v2514_v58 }
 0x2f7   : > { %1944 = vrcp.f32 %v1172_v14  ;;  %v1175_v16 = vadd.f32 1.0, %v1925_v53 }
 0x2f8   : > { %1946 = vpow2.f32 %v1154_v27  ;;  %v1133_v57 = vsub.f32 0.0, %v2509_v61 }
 0x2f9   : > { %1948 = vrcp.f32 %v1175_v16 }
 0x2fa   : > { %v1927_v2 = vpop.eup %1926  ;;  %v1162_v35 = vmul.f32 1.442695, %v1133_v57  ;;  %v337_v57 = vpop.xlane.xlu0 %336 }
 0x2fb   : > { %v1202_v15 = vmul.f32 %v1927_v2, %v2445_v63  ;;  %v1164_v63 = vmul.f32 1.442695, %v1134_v28 }
 0x2fc   : > { %v1929_v6 = vpop.eup %1928 }
 0x2fd   : > { %v1931_v30 = vpop.eup %1930  ;;  %v1200_v7 = vmul.f32 %v1929_v6, %v2449_v45  ;;  %v1225_v18 = vmul.f32 %v2498_v5, %v1202_v15  ;;  %1950 = vpow2.f32 %v1164_v63 }
 0x2fe   : > { %v1933_v26 = vpop.eup %1932  ;;  %v1173_v3 = vadd.f32 1.0, %v1931_v30 }
 0x2ff   : > { %1243 = vadd.xlane.f32.xlu1 %v1225_v18  ;;  %v1935_v31 = vpop.eup %1934  ;;  %v1203_v21 = vmul.f32 %v1933_v26, %v2453_v62  ;;  %v1223_v45 = vmul.f32 %v2498_v5, %v1200_v7 }
 0x300   : > { %v1937_v55 = vpop.eup %1936  ;;  %1952 = vrcp.f32 %v1173_v3  ;;  %v1178_v23 = vadd.f32 1.0, %v1935_v31 }
 0x301   : > { %v1939_v38 = vpop.eup %1938  ;;  %v1201_v22 = vmul.f32 %v1937_v55, %v2457_v56  ;;  %v1226_v62 = vmul.f32 %v2498_v5, %v1203_v21  ;;  %1954 = vpow2.f32 %v1160_v19  ;;  %v1166_v56 = vmul.f32 1.442695, %v1135_v34 }
 0x302   : > { %v1941_v29 = vpop.eup %1940  ;;  %1956 = vrcp.f32 %v1178_v23  ;;  %v1176_v60 = vadd.f32 1.0, %v1939_v38 }
 0x303   : > { %1239 = vadd.xlane.f32.xlu1 %v1223_v45  ;;  %v1943_v39 = vpop.eup %1942  ;;  %v1206_v40 = vmul.f32 %v1941_v29, %v2461_v17  ;;  %v1224_v37 = vmul.f32 %v2498_v5, %v1201_v22  ;;  %1958 = vpow2.f32 %v1162_v35 }
 0x304   : > { %v1945_v9 = vpop.eup %1944  ;;  %1960 = vrcp.f32 %v1176_v60  ;;  %v1179_v41 = vadd.f32 1.0, %v1943_v39 }
 0x305   : > { %v1947_v44 = vpop.eup %1946  ;;  %v1204_v46 = vmul.f32 %v1945_v9, %v2465_v20  ;;  %v1229_v43 = vmul.f32 %v2498_v5, %v1206_v40  ;;  %1962 = vpow2.f32 %v1166_v56 }
 0x306   : > { %v1949_v50 = vpop.eup %1948  ;;  %1964 = vrcp.f32 %v1179_v41  ;;  %v1177_v11 = vadd.f32 1.0, %v1947_v44 }
 0x307   : > { %1245 = vadd.xlane.f32.xlu1 %v1226_v62  ;;  %v1207_v17 = vmul.f32 %v1949_v50, %v2469_v8  ;;  %v1227_v51 = vmul.f32 %v2498_v5, %v1204_v46 }
 0x308   : > { %1966 = vrcp.f32 %v1177_v11 }
 0x309   : > { %v1230_v32 = vmul.f32 %v2498_v5, %v1207_v17 }
 0x30a   : > { %v1951_v36 = vpop.eup %1950 }
 0x30b   : > { %1241 = vadd.xlane.f32.xlu1 %v1224_v37  ;;  %v1182_v20 = vadd.f32 1.0, %v1951_v36  ;;  %v2551_v36 = vstv %s1287_s22 }
 0x30d   : > { %v1953_v52 = vpop.eup %1952  ;;  %1968 = vrcp.f32 %v1182_v20 }
 0x30e   : > { %v1955_v12 = vpop.eup %1954  ;;  %v1205_v54 = vmul.f32 %v1953_v52, %v2473_v47 }
 0x30f   : > { %1251 = vadd.xlane.f32.xlu1 %v1229_v43  ;;  %v1957_v59 = vpop.eup %1956  ;;  %v1180_v8 = vadd.f32 1.0, %v1955_v12 }
 0x310   : > { %v1959_v53 = vpop.eup %1958  ;;  %v1210_v14 = vmul.f32 %v1957_v59, %v2477_v48  ;;  %v1228_v0 = vmul.f32 %v2498_v5, %v1205_v54 }
 0x311   : > { %v1961_v2 = vpop.eup %1960  ;;  %1970 = vrcp.f32 %v1180_v8  ;;  %v1181_v47 = vadd.f32 1.0, %v1959_v53 }
 0x312   : > { %v1963_v15 = vpop.eup %1962  ;;  %v1208_v6 = vmul.f32 %v1961_v2, %v2481_v4  ;;  %v1233_v27 = vmul.f32 %v2498_v5, %v1210_v14 }
 0x313   : > { %1247 = vadd.xlane.f32.xlu1 %v1227_v51  ;;  %v1965_v28 = vpop.eup %1964  ;;  %v1183_v7 = vadd.f32 1.0, %v1963_v15  ;;  %1972 = vrcp.f32 %v1181_v47 }
 0x314   : > { %v1211_v30 = vmul.f32 %v1965_v28, %v2485_v10  ;;  %v1231_v48 = vmul.f32 %v2498_v5, %v1208_v6 }
 0x315   : > { %v1967_v16 = vpop.eup %1966  ;;  %1974 = vrcp.f32 %v1183_v7 }
 0x316   : > { %v1209_v1 = vmul.f32 %v1967_v16, %v2489_v33  ;;  %v1234_v18 = vmul.f32 %v2498_v5, %v1211_v30 }
 0x317   : > { %1253 = vadd.xlane.f32.xlu1 %v1230_v32 }
 0x318   : > { %v1232_v63 = vmul.f32 %v2498_v5, %v1209_v1 }
 0x31a   : > { %v1969_v4 = vpop.eup %1968 }
 0x31b   : > { %1249 = vadd.xlane.f32.xlu1 %v1228_v0  ;;  %v1214_v26 = vmul.f32 %v1969_v4, %v2493_v13 }
 0x31d   : > { %v1237_v31 = vmul.f32 %v2498_v5, %v1214_v26 }
 0x31e   : > { %v1971_v42 = vpop.eup %1970 }
 0x31f   : > { %1259 = vadd.xlane.f32.xlu1 %v1233_v27  ;;  %v1212_v10 = vmul.f32 %v1971_v42, %v2503_v49  ;;  %v339_v49 = vpop.xlane.xlu0 %338 }
 0x320   : > { %v1973_v21 = vpop.eup %1972 }
 0x321   : > { %v1213_v3 = vmul.f32 %v1973_v21, %v2509_v61  ;;  %v1235_v33 = vmul.f32 %v2498_v5, %v1212_v10 }
 0x322   : > { %v1975_v45 = vpop.eup %1974 }
 0x323   : > { %1255 = vadd.xlane.f32.xlu1 %v1231_v48  ;;  %v1215_v55 = vmul.f32 %v1975_v45, %v2514_v58  ;;  %v1236_v13 = vmul.f32 %v2498_v5, %v1213_v3  ;;  %v341_v38 = vpop.xlane.xlu0 %340 }
 0x325   : > { %v1238_v19 = vmul.f32 %v2498_v5, %v1215_v55  ;;  %v2546_v5 = vand.u32 127, %v385_v24 }
 0x327   : > { %1261 = vadd.xlane.f32.xlu1 %v1234_v18  ;;  %v343_v22 = vpop.xlane.xlu0 %342  ;;  %v1327_v44 = vadd.s32 4294967288, %v2546_v5  ;;  %v1334_v51 = vadd.s32 4294967280, %v2546_v5  ;;  %v1325_v24 = vsub.s32 %v2546_v5, %v2222_v25  ;;  %v1341_v20 = vadd.s32 4294967272, %v2546_v5 }
 0x328   : > { %v1348_v32 = vadd.s32 4294967264, %v2546_v5  ;;  %v1355_v8 = vadd.s32 4294967256, %v2546_v5  ;;  %v1362_v26 = vadd.s32 4294967248, %v2546_v5  ;;  %v1369_v10 = vadd.s32 4294967240, %v2546_v5 }
 0x329   : > { %v1330_v17 = vsub.s32 %v1327_v44, %v2222_v25  ;;  %v1337_v15 = vsub.s32 %v1334_v51, %v2222_v25  ;;  %v1344_v28 = vsub.s32 %v1341_v20, %v2222_v25  ;;  %v1390_v44 = vadd.s32 4294967216, %v2546_v5 }
 0x32a   : > { %v1351_v30 = vsub.s32 %v1348_v32, %v2222_v25  ;;  %v1358_v1 = vsub.s32 %v1355_v8, %v2222_v25 }
 0x32b   : > { %1257 = vadd.xlane.f32.xlu1 %v1232_v63  ;;  %v345_v23 = vpop.xlane.xlu0 %344 }
 0x32f   : > { %1267 = vadd.xlane.f32.xlu1 %v1237_v31  ;;  %v347_v62 = vpop.xlane.xlu0 %346 }
 0x333   : > { %1263 = vadd.xlane.f32.xlu1 %v1235_v33  ;;  %v349_v34 = vpop.xlane.xlu0 %348  ;;  %v1376_v33 = vadd.s32 4294967232, %v2546_v5 }
 0x337   : > { %1265 = vadd.xlane.f32.xlu1 %v1236_v13  ;;  %v351_v39 = vpop.xlane.xlu0 %350 }
 0x33b   : > { %1269 = vadd.xlane.f32.xlu1 %v1238_v19  ;;  %v353_v58 = vpop.xlane.xlu0 %352 }
 0x33f   : > { %v355_v9 = vpop.xlane.xlu0 %354 }
 0x343   : > { %v2549_v50 = vpop.xlane.xlu0 %356 }
 0x347   : > { %v359_v2 = vpop.xlane.xlu0 %358 }
 0x34b   : > { %v361_v31 = vpop.xlane.xlu0 %360 }
 0x388   : > { %v1244_v29 = vpop.xlane.xlu1 %1243 }
 0x389   : > { %v1273_v52 = vadd.f32 %v1244_v29, %v341_v38 }
 0x38b   : > { %v1291_v6 = vadd.f32 %v2551_v36, %v1273_v52 }
 0x38c   : > { %v1240_v61 = vpop.xlane.xlu1 %1239 }
 0x38d   : > { %v1271_v43 = vadd.f32 %v1240_v61, %v337_v57  ;;  %v1338_v4 = vrot.slane %v1291_v6, %v1337_v15  ;;  %v1383_v57 = vadd.s32 4294967224, %v2546_v5 }
 0x38f   : > { %v1289_v54 = vadd.f32 %v2551_v36, %v1271_v43 }
 0x390   : > { %v1246_v35 = vpop.xlane.xlu1 %1245 }
 0x391   : > { %v1274_v53 = vadd.f32 %v1246_v35, %v343_v22  ;;  %v1326_v27 = vrot.slane %v1289_v54, %v1325_v24  ;;  %v1393_v54 = vsub.s32 %v1390_v44, %v2222_v25 }
 0x393   : > { %v1292_v48 = vadd.f32 %v2551_v36, %v1274_v53  ;;  %v1411_v53 = vadd.s32 4294967192, %v2546_v5 }
 0x394   : > { %v1242_v40 = vpop.xlane.xlu1 %1241 }
 0x395   : > { %v1272_v46 = vadd.f32 %v1242_v40, %v339_v49  ;;  %v1345_v55 = vrot.slane %v1292_v48, %v1344_v28  ;;  %v1365_v49 = vsub.s32 %v1362_v26, %v2222_v25 }
 0x397   : > { %v1290_v11 = vadd.f32 %v2551_v36, %v1272_v46 }
 0x398   : > { %v1252_v60 = vpop.xlane.xlu1 %1251 }
 0x399   : > { %v1331_v14 = vrot.slane %v1290_v11, %v1330_v17  ;;  %v1277_v63 = vadd.f32 %v1252_v60, %v349_v34  ;;  %v1379_v34 = vsub.s32 %v1376_v33, %v2222_v25  ;;  %v1386_v60 = vsub.s32 %v1383_v57, %v2222_v25 }
 0x39a   : > { %v1397_v17 = vadd.s32 4294967208, %v2546_v5  ;;  %v1404_v11 = vadd.s32 4294967200, %v2546_v5 }
 0x39b   : > { %v1333_v16 = vsel %vm1332_vm0, %v1331_v14, %v1326_v27  ;;  %v1295_v38 = vadd.f32 %v2551_v36, %v1277_v63  ;;  %v1418_v27 = vadd.s32 4294967184, %v2546_v5 }
 0x39c   : > { %v1248_v37 = vpop.xlane.xlu1 %1247  ;;  %v1340_v21 = vsel %vm1339_vm1, %v1338_v4, %v1333_v16  ;;  %v1400_v8 = vsub.s32 %v1397_v17, %v2222_v25  ;;  %v1425_v16 = vadd.s32 4294967176, %v2546_v5 }
 0x39d   : > { %v1275_v59 = vadd.f32 %v1248_v37, %v345_v23  ;;  %v1347_v23 = vsel %vm1346_vm2, %v1345_v55, %v1340_v21  ;;  %v363_v37 = vpop.xlane.xlu0 %362 }
 0x39e   : > { %v1428_v5 = vsub.s32 %v1425_v16, %v2222_v25 }
 0x39f   : > { %v1293_v7 = vadd.f32 %v2551_v36, %v1275_v59 }
 0x3a0   : > { %v1254_v56 = vpop.xlane.xlu1 %1253 }
 0x3a1   : > { %v1352_v3 = vrot.slane %v1293_v7, %v1351_v30  ;;  %v1278_v13 = vadd.f32 %v1254_v56, %v351_v39  ;;  %v1366_v56 = vrot.slane %v1295_v38, %v1365_v49  ;;  %v1414_v7 = vsub.s32 %v1411_v53, %v2222_v25 }
 0x3a3   : > { %v1354_v61 = vsel %vm1353_vm3, %v1352_v3, %v1347_v23  ;;  %v1296_v39 = vadd.f32 %v2551_v36, %v1278_v13 }
 0x3a4   : > { %v1250_v41 = vpop.xlane.xlu1 %1249 }
 0x3a5   : > { %v1276_v0 = vadd.f32 %v1250_v41, %v347_v62  ;;  %v1372_v62 = vsub.s32 %v1369_v10, %v2222_v25 }
 0x3a7   : > { %v1294_v18 = vadd.f32 %v2551_v36, %v1276_v0  ;;  %v1373_v51 = vrot.slane %v1296_v39, %v1372_v62  ;;  %v1407_v0 = vsub.s32 %v1404_v11, %v2222_v25 }
 0x3a8   : > { %v1260_v12 = vpop.xlane.xlu1 %1259 }
 0x3a9   : > { %v1359_v19 = vrot.slane %v1294_v18, %v1358_v1 }
 0x3ab   : > { %v1361_v40 = vsel %vm1360_vm4, %v1359_v19, %v1354_v61 }
 0x3ac   : > { %v1256_v47 = vpop.xlane.xlu1 %1255  ;;  %v1368_v41 = vsel %vm1367_vm5, %v1366_v56, %v1361_v40 }
 0x3ad   : > { %v1279_v45 = vadd.f32 %v1256_v47, %v353_v58  ;;  %v1375_v59 = vsel %vm1374_vm6, %v1373_v51, %v1368_v41 }
 0x3af   : > { %v1297_v35 = vadd.f32 %v2551_v36, %v1279_v45 }
 0x3b0   : > { %v1262_v42 = vpop.xlane.xlu1 %1261 }
 0x3b1   : > { %v1380_v43 = vrot.slane %v1297_v35, %v1379_v34  ;;  %v1282_v52 = vadd.f32 %v1262_v42, %v359_v2  ;;  %v1421_v42 = vsub.s32 %v1418_v27, %v2222_v25 }
 0x3b3   : > { %v1382_v14 = vsel %vm1381_vm7, %v1380_v43, %v1375_v59  ;;  %v1300_v2 = vadd.f32 %v2551_v36, %v1282_v52 }
 0x3b4   : > { %v1258_v22 = vpop.xlane.xlu1 %1257 }
 0x3b5   : > { %v1280_v29 = vadd.f32 %v1258_v22, %v355_v9  ;;  %v1281_v9 = vadd.f32 %v1260_v12, %v2549_v50  ;;  %v365_v50 = vpop.xlane.xlu0 %364  ;;  %v1401_v26 = vrot.slane %v1300_v2, %v1400_v8 }
 0x3b7   : > { %v1298_v58 = vadd.f32 %v2551_v36, %v1280_v29  ;;  %v1299_v20 = vadd.f32 %v2551_v36, %v1281_v9 }
 0x3b8   : > { %v1268_v46 = vpop.xlane.xlu1 %1267 }
 0x3b9   : > { %v1387_v24 = vrot.slane %v1298_v58, %v1386_v60  ;;  %v1394_v47 = vrot.slane %v1299_v20, %v1393_v54  ;;  %v1285_v28 = vadd.f32 %v1268_v46, %v365_v50  ;;  %v367_v4 = vpop.xlane.xlu0 %366 }
 0x3bb   : > { %v1389_v15 = vsel %vm1388_vm8, %v1387_v24, %v1382_v14  ;;  %v1303_v10 = vadd.f32 %v2551_v36, %v1285_v28 }
 0x3bc   : > { %v1264_v32 = vpop.xlane.xlu1 %1263  ;;  %v1396_v1 = vsel %vm1395_vm9, %v1394_v47, %v1389_v15 }
 0x3bd   : > { %v1283_v12 = vadd.f32 %v1264_v32, %v361_v31  ;;  %v1403_v21 = vsel %vm1402_vm10, %v1401_v26, %v1396_v1  ;;  %v1422_v19 = vrot.slane %v1303_v10, %v1421_v42 }
 0x3bf   : > { %v1301_v6 = vadd.f32 %v2551_v36, %v1283_v12 }
 0x3c0   : > { %v1266_v30 = vpop.xlane.xlu1 %1265 }
 0x3c1   : > { %v1284_v48 = vadd.f32 %v1266_v30, %v363_v37  ;;  %v1408_v18 = vrot.slane %v1301_v6, %v1407_v0 }
 0x3c3   : > { %v1302_v63 = vadd.f32 %v2551_v36, %v1284_v48  ;;  %v1410_v45 = vsel %vm1409_vm11, %v1408_v18, %v1403_v21 }
 0x3c4   : > { %v1270_v31 = vpop.xlane.xlu1 %1269 }
 0x3c5   : > { %v1415_v3 = vrot.slane %v1302_v63, %v1414_v7  ;;  %v1286_v33 = vadd.f32 %v1270_v31, %v367_v4 }
 0x3c7   : > { %v1304_v55 = vadd.f32 %v2551_v36, %v1286_v33  ;;  %v1417_v13 = vsel %vm1416_vm12, %v1415_v3, %v1410_v45 }
 0x3c8   : > { %v1424_v49 = vsel %vm1423_vm13, %v1422_v19, %v1417_v13 }
 0x3c9   : > { %v1429_v57 = vrot.slane %v1304_v55, %v1428_v5 }
 0x3cb   : > { %v1431_v25 = vsel %vm1430_vm14, %v1429_v57, %v1424_v49 }
 0x3cc   : > { %1433 = vst [vmem:[%s273_s24] sm:$0x1] %v1431_v25 }
 0x3cd   : > { %1989 = shalt.err (!%p1986_p3)
}
 0x3ce   : > { %s1990_s20 = scalar_lea.hbm %s2610_s28, 16  ;;  %s1994_s22 = scalar_lea.hbm %s2655_s8, 32 }
 0x3cf   : > { %p1991_p4 = scmp.ne.s32.totalorder %s2610_s28, %s1990_s20  ;;  %p1995_p9 = scmp.lt.s32.totalorder %s2610_s28, %s2655_s8 }
 0x3d0   : > { %p1996_p10 = scmp.lt.s32.totalorder %s1994_s22, %s1990_s20 }
 0x3d1   : > { %p1992_p7 = pnand %p1991_p4, %p2122_p5 }
 0x3d2   : > { %p1997_p11 = por %p1996_p10, %p1995_p9 }
 0x3d3   : > { %p1993_p8 = pneg %p1992_p7 }
 0x3d5   : > { %p1998_p12 = pnand %p1997_p11, %p1993_p8 }
 0x3d7   : > { %2001 = shalt.err (!%p1998_p12)
}
 0x3d8   : > { %1705 = dma.vmem_to_hbm [thread:$0]  (%p2122_p5), %s1448_s25, 16, %s2610_s28, %s1435_s11  }
 0x3d9 PF: > { %p1711_p13 = scmp.ge.s32.totalorder %s2036_s10, 2  ;;  %s1459_s26 = sand.u32 1, %s2024_s29  }
 0x3da   : > { %s1460_s27 = scalar_lea.sflag [#allocation5], %s1459_s26 }
 0x3db   : > { %p1708_p0 = pnand %p1711_p13, %p2126_p6 }
 0x3dd   : > { %p1709_p1 = pneg %p1708_p0 }
 0x3df   : > { %2019 = dma.done.wait (%p1709_p1), %s1460_s27, 16  }
 0x3e0   : > { %2021 = vsyncadd (%p1709_p1), %s1460_s27, 4294967280  ;;  %p19_p2 = scmp.ge.s32.totalorder %s2110_s12, 4   ;;  %s2658_s29 = smov %s2028_s30 }
 0x3e1   : > { %s2659_s30 = smov %s2032_s9  ;;  %s2660_s9 = smov %s2120_s15 }
 0x3e2   : > { %s2661_s10 = smov %s2110_s12  ;;  %21 = sbr.rel (!%p19_p2) target bundleno = 5 (0x5), region = 83 }
 0x3e7   :  { %1464 = vsyncpa [#allocation5], 1 }
 0x3e8   :  { %1466 = vsyncpa [#allocation5 + $0x1], 1 }

</bundles_post_ra>
